<compile_context>
chip_gen: v7x
topology: tpu7x:2x2x1
jax: 0.10.0
libtpu: 0.0.40
codegen_flags: <defaults>
</compile_context>

<pallas_src>
import functools

import jax
import jax.numpy as jnp
from jax.experimental import pallas as pl
from jax.experimental.pallas import tpu as pltpu


# ----------------------------------------------------------------------------
# numerics helpers (usable both inside the kernel and in the JAX reference)
# ----------------------------------------------------------------------------
def _erf(x):
    # Abramowitz & Stegun 7.1.26 rational approximation (|err| < 1.5e-7),
    # built only from exp/mul/add/where so it lowers cleanly in Mosaic.
    a1, a2, a3, a4, a5 = 0.254829592, -0.284496736, 1.421413741, -1.453152027, 1.061405429
    p = 0.3275911
    sgn = jnp.where(x >= 0.0, 1.0, -1.0)
    ax = jnp.abs(x)
    t = 1.0 / (1.0 + p * ax)
    poly = ((((a5 * t + a4) * t + a3) * t + a2) * t + a1) * t
    return sgn * (1.0 - poly * jnp.exp(-ax * ax))


def _gelu_exact(x):
    # matches PyTorch nn.GELU() default (erf-based) to ~1e-7
    return 0.5 * x * (1.0 + _erf(x * 0.7071067811865476))


# ----------------------------------------------------------------------------
# Pallas kernel: one grid step == `b_blk` batch elements
# ----------------------------------------------------------------------------
def make_synthmix_kernel(b_blk, T, C, T_r, C_r, reduce_token, reduce_channel,
                         mxu_dtype):
    f32 = jnp.float32

    def mm(a, b):
        # 2-D GEMM on the MXU, f32 accumulation.
        return jnp.dot(a.astype(mxu_dtype), b.astype(mxu_dtype),
                       preferred_element_type=f32)

    def bmm_rr(a, b):
        # (b, M, R) x (b, N, R) -> (b, M, N): batched matmul contracting the last
        # (lane) axis of both operands — the canonical 'bqd,bkd->bqk' MXU pattern.
        return jax.lax.dot_general(
            a.astype(mxu_dtype), b.astype(mxu_dtype),
            dimension_numbers=(((2,), (2,)), ((0,), (0,))),
            preferred_element_type=f32)

    def col_mm(w, v):
        # Per-sample column mat-vec: w (N, K) shared weight, v (b, K, 1) -> (b, N, 1).
        # Keeping the SE / reweight vectors in column orientation avoids any
        # lane<->sublane relayout when broadcasting the gates back onto the energies.
        wb = jnp.broadcast_to(w[None].astype(mxu_dtype), (b_blk,) + w.shape)
        return jax.lax.dot_general(
            wb, v.astype(mxu_dtype),
            dimension_numbers=(((2,), (1,)), ((0,), (0,))),
            preferred_element_type=f32)

    def softmax_lastdim(e):
        e = e - jnp.max(e, axis=-1, keepdims=True)
        p = jnp.exp(e)
        return p * pl.reciprocal(jnp.sum(p, axis=-1, keepdims=True), approx=False)

    def kernel(x_ref,
               wcat1_ref, bcat1_ref, wcat2_ref, bcat2_ref,
               wse1tT_ref, wse2tT_ref, wse1cT_ref, wse2cT_ref,
               w1rT_ref, b1rT_ref, w2rT_ref, b2rT_ref,
               wp_ref, bp_ref,
               o_ref):
        x3 = x_ref[...].astype(f32)                      # (b_blk, T, C)
        x_flat = x3.reshape(b_blk * T, C)                # free reshape (T % 8 == 0)

        # ---- fused GEMM #1 (contract over C): [token.dense | channel.value_reduce]
        g1 = mm(x_flat, wcat1_ref[...]) + bcat1_ref[...]           # (b*T, T_r [+ C_r])
        energy_t = g1[:, :T_r].reshape(b_blk, T, T_r)
        if reduce_channel > 1:
            vcr = g1[:, T_r:].reshape(b_blk, T, C_r)               # x @ wvrc + bvrc
        else:
            vcr = x3                                               # value == x

        # ---- fused GEMM #2 (contract over T): [channel.dense | token.value_reduce]
        xT3 = jnp.swapaxes(x3, 1, 2)                               # (b_blk, C, T)
        xT_flat = xT3.reshape(b_blk * C, T)                        # free reshape (C % 8 == 0)
        g2 = mm(xT_flat, wcat2_ref[...]) + bcat2_ref[...]          # (b*C, C_r [+ T_r])
        energy_c = g2[:, :C_r].reshape(b_blk, C, C_r)
        if reduce_token > 1:
            vtr = g2[:, C_r:].reshape(b_blk, C, T_r)               # x^T @ wvrt + bvrt
        else:
            vtr = xT3                                              # value == x

        # ---- token branch: SE gate + softmax + attention @ value
        y_t = jnp.mean(energy_t, axis=-1, keepdims=True)           # (b, T, 1)
        h_t = jnp.maximum(col_mm(wse1tT_ref[...], y_t), 0.0)       # (b, T//4, 1)
        g_t = jax.nn.sigmoid(col_mm(wse2tT_ref[...], h_t))         # (b, T, 1)
        attn_t = softmax_lastdim(energy_t * g_t)                   # (b, T, T_r)
        t_tc = bmm_rr(attn_t, vtr)                                 # (b, T, C)

        # ---- channel branch: SE gate + softmax + attention @ value
        y_c = jnp.mean(energy_c, axis=-1, keepdims=True)           # (b, C, 1)
        h_c = jnp.maximum(col_mm(wse1cT_ref[...], y_c), 0.0)       # (b, C//4, 1)
        g_c = jax.nn.sigmoid(col_mm(wse2cT_ref[...], h_c))         # (b, C, 1)
        attn_c = softmax_lastdim(energy_c * g_c)                   # (b, C, C_r)
        c_tc = bmm_rr(vcr, attn_c)                                 # (b, T, C)

        # ---- reweight gate: Mlp(T, T//4, 2T) on the channel-averaged signal
        a_col = jnp.mean(t_tc + c_tc, axis=-1, keepdims=True)      # (b, T, 1)
        h3 = _gelu_exact(col_mm(w1rT_ref[...], a_col) + b1rT_ref[...])   # (b, T//4, 1)
        # w2rT / b2rT rows were pre-permuted in the wrapper so rows [0,T) are the
        # gate-0 logits and rows [T,2T) the gate-1 logits (vs. interleaved PyTorch).
        rw = col_mm(w2rT_ref[...], h3) + b2rT_ref[...]             # (b, 2T, 1)
        a0 = rw[:, :T, :]
        a1 = rw[:, T:, :]
        m = jnp.maximum(a0, a1)
        e0 = jnp.exp(a0 - m)
        e1 = jnp.exp(a1 - m)
        inv = pl.reciprocal(e0 + e1, approx=False)
        w0 = e0 * inv
        w1 = e1 * inv                                              # (b, T, 1)

        # ---- combine + final projection (proj_drop: identity)
        out_tc = t_tc * w0 + c_tc * w1                             # (b, T, C)
        out = mm(out_tc.reshape(b_blk * T, C), wp_ref[...]) + bp_ref[...]
        o_ref[...] = out.reshape(b_blk, T, C).astype(o_ref.dtype)

    return kernel


# ----------------------------------------------------------------------------
# wrapper
# ----------------------------------------------------------------------------
@functools.partial(jax.jit,
                   static_argnames=("reduce_token", "reduce_channel",
                                    "block_b", "mxu_dtype"))
def synthmix_pallas(x, params, reduce_token, reduce_channel,
                    block_b=64, mxu_dtype=jnp.float32):
    B, T, C = x.shape
    T_r, C_r = T // reduce_token, C // reduce_channel
    T4, C4 = T // 4, C // 4

    # batch blocking (pad B up to a multiple of the block size)
    b_blk = max(1, min(block_b, B))
    n_blocks = -(-B // b_blk)
    B_pad = n_blocks * b_blk
    x_p = x if B_pad == B else jnp.pad(x, ((0, B_pad - B), (0, 0), (0, 0)))

    # ---- fused / pre-transposed weight packing (done once by XLA, outside the kernel)
    if reduce_channel > 1:
        wcat1 = jnp.concatenate([params["wdt"], params["wvrc"]], axis=1)   # (C, T_r+C_r)
        bcat1 = jnp.concatenate([params["bdt"], params["bvrc"]], axis=1)
    else:
        wcat1, bcat1 = params["wdt"], params["bdt"]                        # (C, T_r)
    if reduce_token > 1:
        wcat2 = jnp.concatenate([params["wdc"], params["wvrt"]], axis=1)   # (T, C_r+T_r)
        bcat2 = jnp.concatenate([params["bdc"], params["bvrt"]], axis=1)
    else:
        wcat2, bcat2 = params["wdc"], params["bdc"]

    # reweight fc2: PyTorch does reshape(B, T, 2).permute(2, 0, 1) — pre-permute the
    # columns so gate-0 logits land in rows [0,T) and gate-1 logits in rows [T,2T).
    perm = jnp.concatenate([jnp.arange(T) * 2, jnp.arange(T) * 2 + 1])
    w2rT = jnp.transpose(params["w2r"][:, perm])        # (2T, T//4)
    b2rT = jnp.transpose(params["b2r"][:, perm])        # (2T, 1)

    weights = [
        wcat1, bcat1, wcat2, bcat2,
        jnp.transpose(params["wse1t"]), jnp.transpose(params["wse2t"]),
        jnp.transpose(params["wse1c"]), jnp.transpose(params["wse2c"]),
        jnp.transpose(params["w1r"]), jnp.transpose(params["b1r"]),
        w2rT, b2rT,
        params["wp"], params["bp"],
    ]

    in_specs = [pl.BlockSpec((b_blk, T, C), lambda b: (b, 0, 0))]
    for w in weights:
        # full-array blocks with a constant index map -> resident, never re-DMA'd
        in_specs.append(pl.BlockSpec(w.shape, lambda b: (0, 0)))

    # advisory cost estimate so XLA schedules this small custom call sensibly
    n1 = T_r + (C_r if reduce_channel > 1 else 0)
    n2 = C_r + (T_r if reduce_token > 1 else 0)
    rt_dim = T_r if reduce_token > 1 else T
    rc_dim = C_r if reduce_channel > 1 else C
    flops = 2 * B_pad * (T * C * n1 + C * T * n2
                         + T * rt_dim * C + C * rc_dim * T
                         + 2 * (T * T4 + C * C4)
                         + T * T4 + T4 * 2 * T
                         + T * C * C)
    transcendentals = B_pad * (T * T_r + C * C_r + 3 * T + C + T4)
    bytes_accessed = 4 * (int(x_p.size) + B_pad * T * C
                          + sum(int(w.size) for w in weights))

    kernel = make_synthmix_kernel(b_blk, T, C, T_r, C_r,
                                  reduce_token, reduce_channel, mxu_dtype)
    out = pl.pallas_call(
        kernel,
        out_shape=jax.ShapeDtypeStruct((B_pad, T, C), jnp.float32),
        grid=(n_blocks,),
        in_specs=in_specs,
        out_specs=pl.BlockSpec((b_blk, T, C), lambda b: (b, 0, 0)),
        compiler_params=pltpu.CompilerParams(
            dimension_semantics=("parallel",),
            vmem_limit_bytes=32 * 1024 * 1024),
        cost_estimate=pl.CostEstimate(flops=flops,
                                      transcendentals=transcendentals,
                                      bytes_accessed=bytes_accessed),
    )(x_p, *weights)
    return out[:B] if B_pad != B else out


# ----------------------------------------------------------------------------
# pure-JAX reference (mirrors the PyTorch forward, original weight layout)
# ----------------------------------------------------------------------------
def synthmix_ref(x, p, reduce_token, reduce_channel):
    B, T, C = x.shape
    # token branch
    e = x @ p["wdt"] + p["bdt"]                                    # (B, T, T_r)
    g = jax.nn.sigmoid(jnp.maximum(e.mean(-1) @ p["wse1t"], 0.0) @ p["wse2t"])
    attn = jax.nn.softmax(e * g[..., None], axis=-1)
    v = x
    if reduce_token > 1:
        v = jnp.swapaxes(jnp.swapaxes(x, 1, 2) @ p["wvrt"] + p["bvrt"], 1, 2)
    t = attn @ v                                                   # (B, T, C)
    # channel branch
    xt = jnp.swapaxes(x, 1, 2)                                     # (B, C, T)
    e2 = xt @ p["wdc"] + p["bdc"]                                  # (B, C, C_r)
    g2 = jax.nn.sigmoid(jnp.maximum(e2.mean(-1) @ p["wse1c"], 0.0) @ p["wse2c"])
    attn2 = jax.nn.softmax(e2 * g2[..., None], axis=-1)
    v2 = xt
    if reduce_channel > 1:
        v2 = jnp.swapaxes(x @ p["wvrc"] + p["bvrc"], 1, 2)         # (B, C_r, T)
    c = jnp.swapaxes(attn2 @ v2, 1, 2)                             # (B, T, C)
    # reweight gate
    t_ct = jnp.swapaxes(t, 1, 2)                                   # (B, C, T)
    c_ct = jnp.swapaxes(c, 1, 2)
    a = jnp.mean(t_ct + c_ct, axis=1)                              # (B, T)
    h = jax.nn.gelu(a @ p["w1r"] + p["b1r"], approximate=False)
    rw = h @ p["w2r"] + p["b2r"]                                   # (B, 2T)
    aw = jax.nn.softmax(rw.reshape(B, T, 2).transpose(2, 0, 1), axis=0)   # (2, B, T)
    out = (jnp.stack([t_ct, c_ct], 0) * aw[:, :, None, :]).sum(0)  # (B, C, T)
    out = jnp.swapaxes(out, 1, 2)                                  # (B, T, C)
    return out @ p["wp"] + p["bp"]


# ----------------------------------------------------------------------------
# deterministic parameter init (shapes from SynthMix.__init__)
# ----------------------------------------------------------------------------
def init_params(key, T, C, reduce_token, reduce_channel):
    T_r, C_r = T // reduce_token, C // reduce_channel
    T4, C4 = T // 4, C // 4
    ks = jax.random.split(key, 18)
    w = lambda k, s: jax.random.normal(k, s, jnp.float32) * 0.1
    return dict(
        wdt=w(ks[0], (C, T_r)),   bdt=w(ks[1], (1, T_r)),     # synth_token.dense
        wse1t=w(ks[2], (T, T4)),  wse2t=w(ks[3], (T4, T)),    # synth_token.se.fc (no bias)
        wvrt=w(ks[4], (T, T_r)),  bvrt=w(ks[5], (1, T_r)),    # synth_token.value_reduce
        wdc=w(ks[6], (T, C_r)),   bdc=w(ks[7], (1, C_r)),     # synth_channel.dense
        wse1c=w(ks[8], (C, C4)),  wse2c=w(ks[9], (C4, C)),    # synth_channel.se.fc
        wvrc=w(ks[10], (C, C_r)), bvrc=w(ks[11], (1, C_r)),   # synth_channel.value_reduce
        w1r=w(ks[12], (T, T4)),   b1r=w(ks[13], (1, T4)),     # reweight.fc1
        w2r=w(ks[14], (T4, 2 * T)), b2r=w(ks[15], (1, 2 * T)),# reweight.fc2
        wp=w(ks[16], (C, C)),     bp=w(ks[17], (1, C)),       # proj
    )


if __name__ == "__main__":
    B, T, C = 8, 16, 32            # batch, temporal_dim, channel_dim
    # proj_drop = 0.0 -> dropout layers are identity

    key = jax.random.PRNGKey(0)
    kx, kp = jax.random.split(key)
    x = jax.random.normal(kx, (B, T, C), jnp.float32)

    # exercise both the value-reduced and the reduce==1 (no value_reduce) paths
    for reduce_token, reduce_channel in [(2, 2), (1, 1)]:
        params = init_params(kp, T, C, reduce_token, reduce_channel)
        out = synthmix_pallas(x, params, reduce_token=reduce_token,
                              reduce_channel=reduce_channel, block_b=4)
        jax.block_until_ready(out)

        ref = synthmix_ref(x, params, reduce_token, reduce_channel)
        assert out.shape == (B, T, C)
        err = float(jnp.max(jnp.abs(out - ref)))
        assert err < 2e-4, (
            f"reduce=({reduce_token},{reduce_channel}) max abs diff = {err:e}")

    print("KERNEL_OK")
</pallas_src>

<mosaic_0001>
module attributes {stable_mosaic.version = 11 : i64} {
  func.func @kernel(%arg0: i32, %arg1: memref<4x16x32xf32, #tpu.memory_space<vmem>>, %arg2: memref<32x24xf32, #tpu.memory_space<vmem>>, %arg3: memref<1x24xf32, #tpu.memory_space<vmem>>, %arg4: memref<16x24xf32, #tpu.memory_space<vmem>>, %arg5: memref<1x24xf32, #tpu.memory_space<vmem>>, %arg6: memref<4x16xf32, #tpu.memory_space<vmem>>, %arg7: memref<16x4xf32, #tpu.memory_space<vmem>>, %arg8: memref<8x32xf32, #tpu.memory_space<vmem>>, %arg9: memref<32x8xf32, #tpu.memory_space<vmem>>, %arg10: memref<4x16xf32, #tpu.memory_space<vmem>>, %arg11: memref<4x1xf32, #tpu.memory_space<vmem>>, %arg12: memref<32x4xf32, #tpu.memory_space<vmem>>, %arg13: memref<32x1xf32, #tpu.memory_space<vmem>>, %arg14: memref<32x32xf32, #tpu.memory_space<vmem>>, %arg15: memref<1x32xf32, #tpu.memory_space<vmem>>, %arg16: memref<4x16x32xf32, #tpu.memory_space<vmem>>) attributes {dimension_semantics = [#tpu.dimension_semantics<parallel>], iteration_bounds = array<i64: 2>, scalar_prefetch = 0 : i64, scratch_operands = 0 : i64, tpu.core_type = #tpu.core_type<tc>, window_params = [{transform_indices = @transform_0, window_bounds = array<i64: 4, 16, 32>}, {pipeline_mode = #tpu.pipeline_mode<synchronous>, transform_indices = @transform_1, window_bounds = array<i64: 32, 24>}, {pipeline_mode = #tpu.pipeline_mode<synchronous>, transform_indices = @transform_2, window_bounds = array<i64: 1, 24>}, {pipeline_mode = #tpu.pipeline_mode<synchronous>, transform_indices = @transform_3, window_bounds = array<i64: 16, 24>}, {pipeline_mode = #tpu.pipeline_mode<synchronous>, transform_indices = @transform_4, window_bounds = array<i64: 1, 24>}, {pipeline_mode = #tpu.pipeline_mode<synchronous>, transform_indices = @transform_5, window_bounds = array<i64: 4, 16>}, {pipeline_mode = #tpu.pipeline_mode<synchronous>, transform_indices = @transform_6, window_bounds = array<i64: 16, 4>}, {pipeline_mode = #tpu.pipeline_mode<synchronous>, transform_indices = @transform_7, window_bounds = array<i64: 8, 32>}, {pipeline_mode = #tpu.pipeline_mode<synchronous>, transform_indices = @transform_8, window_bounds = array<i64: 32, 8>}, {pipeline_mode = #tpu.pipeline_mode<synchronous>, transform_indices = @transform_9, window_bounds = array<i64: 4, 16>}, {pipeline_mode = #tpu.pipeline_mode<synchronous>, transform_indices = @transform_10, window_bounds = array<i64: 4, 1>}, {pipeline_mode = #tpu.pipeline_mode<synchronous>, transform_indices = @transform_11, window_bounds = array<i64: 32, 4>}, {pipeline_mode = #tpu.pipeline_mode<synchronous>, transform_indices = @transform_12, window_bounds = array<i64: 32, 1>}, {pipeline_mode = #tpu.pipeline_mode<synchronous>, transform_indices = @transform_13, window_bounds = array<i64: 32, 32>}, {pipeline_mode = #tpu.pipeline_mode<synchronous>, transform_indices = @transform_14, window_bounds = array<i64: 1, 32>}, {transform_indices = @transform_15, window_bounds = array<i64: 4, 16, 32>}]} {
    %c0 = arith.constant 0 : index
    %c0_0 = arith.constant 0 : index
    %c0_1 = arith.constant 0 : index
    %0 = vector.load %arg1[%c0, %c0_0, %c0_1] : memref<4x16x32xf32, #tpu.memory_space<vmem>>, vector<4x16x32xf32>
    %1 = vector.shape_cast %0 : vector<4x16x32xf32> to vector<64x32xf32>
    %c0_2 = arith.constant 0 : index
    %c0_3 = arith.constant 0 : index
    %2 = vector.load %arg2[%c0_2, %c0_3] : memref<32x24xf32, #tpu.memory_space<vmem>>, vector<32x24xf32>
    %cst = arith.constant dense<0.000000e+00> : vector<64x24xf32>
    %3 = tpu.matmul %1, %2, %cst {dimension_numbers = #tpu.dot_dimension_numbers<[1], [0], [0], [1], [0, 0, 1, 1], [], []>} : vector<64x32xf32>, vector<32x24xf32>, vector<64x24xf32> -> vector<64x24xf32>
    %c0_4 = arith.constant 0 : index
    %c0_5 = arith.constant 0 : index
    %4 = vector.load %arg3[%c0_4, %c0_5] : memref<1x24xf32, #tpu.memory_space<vmem>>, vector<1x24xf32>
    %5 = vector.broadcast %4 : vector<1x24xf32> to vector<64x24xf32>
    %6 = arith.addf %3, %5 : vector<64x24xf32>
    %7 = vector.extract_strided_slice %6 {offsets = [0, 0], sizes = [64, 8], strides = [1, 1]} : vector<64x24xf32> to vector<64x8xf32>
    %8 = vector.shape_cast %7 : vector<64x8xf32> to vector<4x16x8xf32>
    %9 = vector.extract_strided_slice %6 {offsets = [0, 8], sizes = [64, 16], strides = [1, 1]} : vector<64x24xf32> to vector<64x16xf32>
    %10 = vector.shape_cast %9 : vector<64x16xf32> to vector<4x16x16xf32>
    %11 = tpu.transpose %0, [0, 2, 1] : vector<4x16x32xf32> -> vector<4x32x16xf32>
    %12 = vector.shape_cast %11 : vector<4x32x16xf32> to vector<128x16xf32>
    %c0_6 = arith.constant 0 : index
    %c0_7 = arith.constant 0 : index
    %13 = vector.load %arg4[%c0_6, %c0_7] : memref<16x24xf32, #tpu.memory_space<vmem>>, vector<16x24xf32>
    %cst_8 = arith.constant dense<0.000000e+00> : vector<128x24xf32>
    %14 = tpu.matmul %12, %13, %cst_8 {dimension_numbers = #tpu.dot_dimension_numbers<[1], [0], [0], [1], [0, 0, 1, 1], [], []>} : vector<128x16xf32>, vector<16x24xf32>, vector<128x24xf32> -> vector<128x24xf32>
    %c0_9 = arith.constant 0 : index
    %c0_10 = arith.constant 0 : index
    %15 = vector.load %arg5[%c0_9, %c0_10] : memref<1x24xf32, #tpu.memory_space<vmem>>, vector<1x24xf32>
    %16 = vector.broadcast %15 : vector<1x24xf32> to vector<128x24xf32>
    %17 = arith.addf %14, %16 : vector<128x24xf32>
    %18 = vector.extract_strided_slice %17 {offsets = [0, 0], sizes = [128, 16], strides = [1, 1]} : vector<128x24xf32> to vector<128x16xf32>
    %19 = vector.shape_cast %18 : vector<128x16xf32> to vector<4x32x16xf32>
    %20 = vector.extract_strided_slice %17 {offsets = [0, 16], sizes = [128, 8], strides = [1, 1]} : vector<128x24xf32> to vector<128x8xf32>
    %21 = vector.shape_cast %20 : vector<128x8xf32> to vector<4x32x8xf32>
    %cst_11 = arith.constant dense<0.000000e+00> : vector<4x16xf32>
    %22 = vector.multi_reduction <add>, %8, %cst_11 [2] : vector<4x16x8xf32> to vector<4x16xf32>
    %23 = vector.shape_cast %22 : vector<4x16xf32> to vector<4x16x1xf32>
    %cst_12 = arith.constant 8.000000e+00 : f32
    %24 = vector.broadcast %cst_12 : f32 to vector<4x16x1xf32>
    %25 = arith.divf %23, %24 : vector<4x16x1xf32>
    %c0_13 = arith.constant 0 : index
    %c0_14 = arith.constant 0 : index
    %26 = vector.load %arg6[%c0_13, %c0_14] : memref<4x16xf32, #tpu.memory_space<vmem>>, vector<4x16xf32>
    %27 = vector.shape_cast %26 : vector<4x16xf32> to vector<1x4x16xf32>
    %28 = vector.shape_cast %27 : vector<1x4x16xf32> to vector<1x4x16xf32>
    %29 = vector.broadcast %28 : vector<1x4x16xf32> to vector<4x4x16xf32>
    %cst_15 = arith.constant dense<0.000000e+00> : vector<4x4x1xf32>
    %30 = tpu.matmul %29, %25, %cst_15 {dimension_numbers = #tpu.dot_dimension_numbers<[2], [1], [1], [2], [0, 0, 0, 1, 1, 2], [0], [0]>} : vector<4x4x16xf32>, vector<4x16x1xf32>, vector<4x4x1xf32> -> vector<4x4x1xf32>
    %cst_16 = arith.constant 0.000000e+00 : f32
    %31 = vector.broadcast %cst_16 : f32 to vector<4x4x1xf32>
    %32 = arith.maximumf %30, %31 : vector<4x4x1xf32>
    %c0_17 = arith.constant 0 : index
    %c0_18 = arith.constant 0 : index
    %33 = vector.load %arg7[%c0_17, %c0_18] : memref<16x4xf32, #tpu.memory_space<vmem>>, vector<16x4xf32>
    %34 = vector.shape_cast %33 : vector<16x4xf32> to vector<1x16x4xf32>
    %35 = vector.shape_cast %34 : vector<1x16x4xf32> to vector<1x16x4xf32>
    %36 = vector.broadcast %35 : vector<1x16x4xf32> to vector<4x16x4xf32>
    %cst_19 = arith.constant dense<0.000000e+00> : vector<4x16x1xf32>
    %37 = tpu.matmul %36, %32, %cst_19 {dimension_numbers = #tpu.dot_dimension_numbers<[2], [1], [1], [2], [0, 0, 0, 1, 1, 2], [0], [0]>} : vector<4x16x4xf32>, vector<4x4x1xf32>, vector<4x16x1xf32> -> vector<4x16x1xf32>
    %38 = arith.negf %37 : vector<4x16x1xf32>
    %39 = math.exp %38 : vector<4x16x1xf32>
    %cst_20 = arith.constant 1.000000e+00 : f32
    %40 = vector.broadcast %cst_20 : f32 to vector<4x16x1xf32>
    %41 = arith.addf %40, %39 : vector<4x16x1xf32>
    %42 = arith.divf %40, %41 : vector<4x16x1xf32>
    %43 = vector.broadcast %42 : vector<4x16x1xf32> to vector<4x16x8xf32>
    %44 = arith.mulf %8, %43 : vector<4x16x8xf32>
    %cst_21 = arith.constant dense<0xFF800000> : vector<4x16xf32>
    %45 = vector.multi_reduction <maximumf>, %44, %cst_21 [2] : vector<4x16x8xf32> to vector<4x16xf32>
    %46 = vector.shape_cast %45 : vector<4x16xf32> to vector<4x16x1xf32>
    %47 = vector.broadcast %46 : vector<4x16x1xf32> to vector<4x16x8xf32>
    %48 = arith.subf %44, %47 : vector<4x16x8xf32>
    %49 = math.exp %48 : vector<4x16x8xf32>
    %cst_22 = arith.constant dense<0.000000e+00> : vector<4x16xf32>
    %50 = vector.multi_reduction <add>, %49, %cst_22 [2] : vector<4x16x8xf32> to vector<4x16xf32>
    %51 = vector.shape_cast %50 : vector<4x16xf32> to vector<4x16x1xf32>
    %52 = tpu.reciprocal %51 : vector<4x16x1xf32> -> vector<4x16x1xf32>
    %53 = vector.broadcast %52 : vector<4x16x1xf32> to vector<4x16x8xf32>
    %54 = arith.mulf %49, %53 : vector<4x16x8xf32>
    %cst_23 = arith.constant dense<0.000000e+00> : vector<4x16x32xf32>
    %55 = tpu.matmul %54, %21, %cst_23 {dimension_numbers = #tpu.dot_dimension_numbers<[2], [2], [1], [1], [0, 0, 0, 1, 1, 1], [0], [0]>} : vector<4x16x8xf32>, vector<4x32x8xf32>, vector<4x16x32xf32> -> vector<4x16x32xf32>
    %cst_24 = arith.constant dense<0.000000e+00> : vector<4x32xf32>
    %56 = vector.multi_reduction <add>, %19, %cst_24 [2] : vector<4x32x16xf32> to vector<4x32xf32>
    %57 = vector.shape_cast %56 : vector<4x32xf32> to vector<4x32x1xf32>
    %cst_25 = arith.constant 1.600000e+01 : f32
    %58 = vector.broadcast %cst_25 : f32 to vector<4x32x1xf32>
    %59 = arith.divf %57, %58 : vector<4x32x1xf32>
    %c0_26 = arith.constant 0 : index
    %c0_27 = arith.constant 0 : index
    %60 = vector.load %arg8[%c0_26, %c0_27] : memref<8x32xf32, #tpu.memory_space<vmem>>, vector<8x32xf32>
    %61 = vector.shape_cast %60 : vector<8x32xf32> to vector<1x8x32xf32>
    %62 = vector.shape_cast %61 : vector<1x8x32xf32> to vector<1x8x32xf32>
    %63 = vector.broadcast %62 : vector<1x8x32xf32> to vector<4x8x32xf32>
    %cst_28 = arith.constant dense<0.000000e+00> : vector<4x8x1xf32>
    %64 = tpu.matmul %63, %59, %cst_28 {dimension_numbers = #tpu.dot_dimension_numbers<[2], [1], [1], [2], [0, 0, 0, 1, 1, 2], [0], [0]>} : vector<4x8x32xf32>, vector<4x32x1xf32>, vector<4x8x1xf32> -> vector<4x8x1xf32>
    %cst_29 = arith.constant 0.000000e+00 : f32
    %65 = vector.broadcast %cst_29 : f32 to vector<4x8x1xf32>
    %66 = arith.maximumf %64, %65 : vector<4x8x1xf32>
    %c0_30 = arith.constant 0 : index
    %c0_31 = arith.constant 0 : index
    %67 = vector.load %arg9[%c0_30, %c0_31] : memref<32x8xf32, #tpu.memory_space<vmem>>, vector<32x8xf32>
    %68 = vector.shape_cast %67 : vector<32x8xf32> to vector<1x32x8xf32>
    %69 = vector.shape_cast %68 : vector<1x32x8xf32> to vector<1x32x8xf32>
    %70 = vector.broadcast %69 : vector<1x32x8xf32> to vector<4x32x8xf32>
    %cst_32 = arith.constant dense<0.000000e+00> : vector<4x32x1xf32>
    %71 = tpu.matmul %70, %66, %cst_32 {dimension_numbers = #tpu.dot_dimension_numbers<[2], [1], [1], [2], [0, 0, 0, 1, 1, 2], [0], [0]>} : vector<4x32x8xf32>, vector<4x8x1xf32>, vector<4x32x1xf32> -> vector<4x32x1xf32>
    %72 = arith.negf %71 : vector<4x32x1xf32>
    %73 = math.exp %72 : vector<4x32x1xf32>
    %cst_33 = arith.constant 1.000000e+00 : f32
    %74 = vector.broadcast %cst_33 : f32 to vector<4x32x1xf32>
    %75 = arith.addf %74, %73 : vector<4x32x1xf32>
    %76 = arith.divf %74, %75 : vector<4x32x1xf32>
    %77 = vector.broadcast %76 : vector<4x32x1xf32> to vector<4x32x16xf32>
    %78 = arith.mulf %19, %77 : vector<4x32x16xf32>
    %cst_34 = arith.constant dense<0xFF800000> : vector<4x32xf32>
    %79 = vector.multi_reduction <maximumf>, %78, %cst_34 [2] : vector<4x32x16xf32> to vector<4x32xf32>
    %80 = vector.shape_cast %79 : vector<4x32xf32> to vector<4x32x1xf32>
    %81 = vector.broadcast %80 : vector<4x32x1xf32> to vector<4x32x16xf32>
    %82 = arith.subf %78, %81 : vector<4x32x16xf32>
    %83 = math.exp %82 : vector<4x32x16xf32>
    %cst_35 = arith.constant dense<0.000000e+00> : vector<4x32xf32>
    %84 = vector.multi_reduction <add>, %83, %cst_35 [2] : vector<4x32x16xf32> to vector<4x32xf32>
    %85 = vector.shape_cast %84 : vector<4x32xf32> to vector<4x32x1xf32>
    %86 = tpu.reciprocal %85 : vector<4x32x1xf32> -> vector<4x32x1xf32>
    %87 = vector.broadcast %86 : vector<4x32x1xf32> to vector<4x32x16xf32>
    %88 = arith.mulf %83, %87 : vector<4x32x16xf32>
    %cst_36 = arith.constant dense<0.000000e+00> : vector<4x16x32xf32>
    %89 = tpu.matmul %10, %88, %cst_36 {dimension_numbers = #tpu.dot_dimension_numbers<[2], [2], [1], [1], [0, 0, 0, 1, 1, 1], [0], [0]>} : vector<4x16x16xf32>, vector<4x32x16xf32>, vector<4x16x32xf32> -> vector<4x16x32xf32>
    %90 = arith.addf %55, %89 : vector<4x16x32xf32>
    %cst_37 = arith.constant dense<0.000000e+00> : vector<4x16xf32>
    %91 = vector.multi_reduction <add>, %90, %cst_37 [2] : vector<4x16x32xf32> to vector<4x16xf32>
    %92 = vector.shape_cast %91 : vector<4x16xf32> to vector<4x16x1xf32>
    %cst_38 = arith.constant 3.200000e+01 : f32
    %93 = vector.broadcast %cst_38 : f32 to vector<4x16x1xf32>
    %94 = arith.divf %92, %93 : vector<4x16x1xf32>
    %c0_39 = arith.constant 0 : index
    %c0_40 = arith.constant 0 : index
    %95 = vector.load %arg10[%c0_39, %c0_40] : memref<4x16xf32, #tpu.memory_space<vmem>>, vector<4x16xf32>
    %96 = vector.shape_cast %95 : vector<4x16xf32> to vector<1x4x16xf32>
    %97 = vector.shape_cast %96 : vector<1x4x16xf32> to vector<1x4x16xf32>
    %98 = vector.broadcast %97 : vector<1x4x16xf32> to vector<4x4x16xf32>
    %cst_41 = arith.constant dense<0.000000e+00> : vector<4x4x1xf32>
    %99 = tpu.matmul %98, %94, %cst_41 {dimension_numbers = #tpu.dot_dimension_numbers<[2], [1], [1], [2], [0, 0, 0, 1, 1, 2], [0], [0]>} : vector<4x4x16xf32>, vector<4x16x1xf32>, vector<4x4x1xf32> -> vector<4x4x1xf32>
    %c0_42 = arith.constant 0 : index
    %c0_43 = arith.constant 0 : index
    %100 = vector.load %arg11[%c0_42, %c0_43] : memref<4x1xf32, #tpu.memory_space<vmem>>, vector<4x1xf32>
    %101 = vector.shape_cast %100 : vector<4x1xf32> to vector<1x4x1xf32>
    %102 = vector.broadcast %101 : vector<1x4x1xf32> to vector<4x4x1xf32>
    %103 = arith.addf %99, %102 : vector<4x4x1xf32>
    %cst_44 = arith.constant 5.000000e-01 : f32
    %104 = vector.broadcast %cst_44 : f32 to vector<4x4x1xf32>
    %105 = arith.mulf %104, %103 : vector<4x4x1xf32>
    %cst_45 = arith.constant 0.707106769 : f32
    %106 = vector.broadcast %cst_45 : f32 to vector<4x4x1xf32>
    %107 = arith.mulf %103, %106 : vector<4x4x1xf32>
    %cst_46 = arith.constant 0.000000e+00 : f32
    %108 = vector.broadcast %cst_46 : f32 to vector<4x4x1xf32>
    %109 = arith.cmpf oge, %107, %108 : vector<4x4x1xf32>
    %cst_47 = arith.constant 1.000000e+00 : f32
    %cst_48 = arith.constant -1.000000e+00 : f32
    %110 = vector.broadcast %cst_47 : f32 to vector<4x4x1xf32>
    %111 = vector.broadcast %cst_48 : f32 to vector<4x4x1xf32>
    %112 = arith.select %109, %110, %111 : vector<4x4x1xi1>, vector<4x4x1xf32>
    %113 = math.absf %107 : vector<4x4x1xf32>
    %cst_49 = arith.constant 0.327591091 : f32
    %114 = vector.broadcast %cst_49 : f32 to vector<4x4x1xf32>
    %115 = arith.mulf %114, %113 : vector<4x4x1xf32>
    %cst_50 = arith.constant 1.000000e+00 : f32
    %116 = vector.broadcast %cst_50 : f32 to vector<4x4x1xf32>
    %117 = arith.addf %116, %115 : vector<4x4x1xf32>
    %cst_51 = arith.constant 1.000000e+00 : f32
    %118 = vector.broadcast %cst_51 : f32 to vector<4x4x1xf32>
    %119 = arith.divf %118, %117 : vector<4x4x1xf32>
    %cst_52 = arith.constant 1.06140542 : f32
    %120 = vector.broadcast %cst_52 : f32 to vector<4x4x1xf32>
    %121 = arith.mulf %120, %119 : vector<4x4x1xf32>
    %cst_53 = arith.constant -1.45315206 : f32
    %122 = vector.broadcast %cst_53 : f32 to vector<4x4x1xf32>
    %123 = arith.addf %121, %122 : vector<4x4x1xf32>
    %124 = arith.mulf %123, %119 : vector<4x4x1xf32>
    %cst_54 = arith.constant 1.42141378 : f32
    %125 = vector.broadcast %cst_54 : f32 to vector<4x4x1xf32>
    %126 = arith.addf %124, %125 : vector<4x4x1xf32>
    %127 = arith.mulf %126, %119 : vector<4x4x1xf32>
    %cst_55 = arith.constant -0.284496725 : f32
    %128 = vector.broadcast %cst_55 : f32 to vector<4x4x1xf32>
    %129 = arith.addf %127, %128 : vector<4x4x1xf32>
    %130 = arith.mulf %129, %119 : vector<4x4x1xf32>
    %cst_56 = arith.constant 0.254829586 : f32
    %131 = vector.broadcast %cst_56 : f32 to vector<4x4x1xf32>
    %132 = arith.addf %130, %131 : vector<4x4x1xf32>
    %133 = arith.mulf %132, %119 : vector<4x4x1xf32>
    %cst_57 = arith.constant 0.000000e+00 : f32
    %134 = vector.broadcast %cst_57 : f32 to vector<4x4x1xf32>
    %135 = arith.subf %134, %113 : vector<4x4x1xf32>
    %136 = arith.mulf %135, %113 : vector<4x4x1xf32>
    %137 = math.exp %136 : vector<4x4x1xf32>
    %138 = arith.mulf %133, %137 : vector<4x4x1xf32>
    %cst_58 = arith.constant 1.000000e+00 : f32
    %139 = vector.broadcast %cst_58 : f32 to vector<4x4x1xf32>
    %140 = arith.subf %139, %138 : vector<4x4x1xf32>
    %141 = arith.mulf %112, %140 : vector<4x4x1xf32>
    %cst_59 = arith.constant 1.000000e+00 : f32
    %142 = vector.broadcast %cst_59 : f32 to vector<4x4x1xf32>
    %143 = arith.addf %142, %141 : vector<4x4x1xf32>
    %144 = arith.mulf %105, %143 : vector<4x4x1xf32>
    %c0_60 = arith.constant 0 : index
    %c0_61 = arith.constant 0 : index
    %145 = vector.load %arg12[%c0_60, %c0_61] : memref<32x4xf32, #tpu.memory_space<vmem>>, vector<32x4xf32>
    %146 = vector.shape_cast %145 : vector<32x4xf32> to vector<1x32x4xf32>
    %147 = vector.shape_cast %146 : vector<1x32x4xf32> to vector<1x32x4xf32>
    %148 = vector.broadcast %147 : vector<1x32x4xf32> to vector<4x32x4xf32>
    %cst_62 = arith.constant dense<0.000000e+00> : vector<4x32x1xf32>
    %149 = tpu.matmul %148, %144, %cst_62 {dimension_numbers = #tpu.dot_dimension_numbers<[2], [1], [1], [2], [0, 0, 0, 1, 1, 2], [0], [0]>} : vector<4x32x4xf32>, vector<4x4x1xf32>, vector<4x32x1xf32> -> vector<4x32x1xf32>
    %c0_63 = arith.constant 0 : index
    %c0_64 = arith.constant 0 : index
    %150 = vector.load %arg13[%c0_63, %c0_64] : memref<32x1xf32, #tpu.memory_space<vmem>>, vector<32x1xf32>
    %151 = vector.shape_cast %150 : vector<32x1xf32> to vector<1x32x1xf32>
    %152 = vector.broadcast %151 : vector<1x32x1xf32> to vector<4x32x1xf32>
    %153 = arith.addf %149, %152 : vector<4x32x1xf32>
    %154 = vector.extract_strided_slice %153 {offsets = [0, 0, 0], sizes = [4, 16, 1], strides = [1, 1, 1]} : vector<4x32x1xf32> to vector<4x16x1xf32>
    %155 = vector.extract_strided_slice %153 {offsets = [0, 16, 0], sizes = [4, 16, 1], strides = [1, 1, 1]} : vector<4x32x1xf32> to vector<4x16x1xf32>
    %156 = arith.maximumf %154, %155 : vector<4x16x1xf32>
    %157 = arith.subf %154, %156 : vector<4x16x1xf32>
    %158 = math.exp %157 : vector<4x16x1xf32>
    %159 = arith.subf %155, %156 : vector<4x16x1xf32>
    %160 = math.exp %159 : vector<4x16x1xf32>
    %161 = arith.addf %158, %160 : vector<4x16x1xf32>
    %162 = tpu.reciprocal %161 : vector<4x16x1xf32> -> vector<4x16x1xf32>
    %163 = arith.mulf %158, %162 : vector<4x16x1xf32>
    %164 = arith.mulf %160, %162 : vector<4x16x1xf32>
    %165 = vector.broadcast %163 : vector<4x16x1xf32> to vector<4x16x32xf32>
    %166 = arith.mulf %55, %165 : vector<4x16x32xf32>
    %167 = vector.broadcast %164 : vector<4x16x1xf32> to vector<4x16x32xf32>
    %168 = arith.mulf %89, %167 : vector<4x16x32xf32>
    %169 = arith.addf %166, %168 : vector<4x16x32xf32>
    %170 = vector.shape_cast %169 : vector<4x16x32xf32> to vector<64x32xf32>
    %c0_65 = arith.constant 0 : index
    %c0_66 = arith.constant 0 : index
    %171 = vector.load %arg14[%c0_65, %c0_66] : memref<32x32xf32, #tpu.memory_space<vmem>>, vector<32x32xf32>
    %cst_67 = arith.constant dense<0.000000e+00> : vector<64x32xf32>
    %172 = tpu.matmul %170, %171, %cst_67 {dimension_numbers = #tpu.dot_dimension_numbers<[1], [0], [0], [1], [0, 0, 1, 1], [], []>} : vector<64x32xf32>, vector<32x32xf32>, vector<64x32xf32> -> vector<64x32xf32>
    %c0_68 = arith.constant 0 : index
    %c0_69 = arith.constant 0 : index
    %173 = vector.load %arg15[%c0_68, %c0_69] : memref<1x32xf32, #tpu.memory_space<vmem>>, vector<1x32xf32>
    %174 = vector.broadcast %173 : vector<1x32xf32> to vector<64x32xf32>
    %175 = arith.addf %172, %174 : vector<64x32xf32>
    %176 = vector.shape_cast %175 : vector<64x32xf32> to vector<4x16x32xf32>
    %c0_70 = arith.constant 0 : index
    %c0_71 = arith.constant 0 : index
    %c0_72 = arith.constant 0 : index
    %177 = vector.load %arg16[%c0_70, %c0_71, %c0_72] : memref<4x16x32xf32, #tpu.memory_space<vmem>>, vector<4x16x32xf32>
    tpu.vector_store %arg16[%c0_70, %c0_71, %c0_72], %176 {strides = array<i32>} : memref<4x16x32xf32, #tpu.memory_space<vmem>>, vector<4x16x32xf32>,
    return
  }
  func.func @transform_0(%arg0: i32) -> (i32, i32, i32) {
    %c0_i32 = arith.constant 0 : i32
    %c0_i32_0 = arith.constant 0 : i32
    %c0_i32_1 = arith.constant 0 : i32
    return %arg0, %c0_i32, %c0_i32_0 : i32, i32, i32
  }
  func.func @transform_1(%arg0: i32) -> (i32, i32) {
    %c0_i32 = arith.constant 0 : i32
    %c0_i32_0 = arith.constant 0 : i32
    %c0_i32_1 = arith.constant 0 : i32
    return %c0_i32, %c0_i32_0 : i32, i32
  }
  func.func @transform_2(%arg0: i32) -> (i32, i32) {
    %c0_i32 = arith.constant 0 : i32
    %c0_i32_0 = arith.constant 0 : i32
    %c0_i32_1 = arith.constant 0 : i32
    return %c0_i32, %c0_i32_0 : i32, i32
  }
  func.func @transform_3(%arg0: i32) -> (i32, i32) {
    %c0_i32 = arith.constant 0 : i32
    %c0_i32_0 = arith.constant 0 : i32
    %c0_i32_1 = arith.constant 0 : i32
    return %c0_i32, %c0_i32_0 : i32, i32
  }
  func.func @transform_4(%arg0: i32) -> (i32, i32) {
    %c0_i32 = arith.constant 0 : i32
    %c0_i32_0 = arith.constant 0 : i32
    %c0_i32_1 = arith.constant 0 : i32
    return %c0_i32, %c0_i32_0 : i32, i32
  }
  func.func @transform_5(%arg0: i32) -> (i32, i32) {
    %c0_i32 = arith.constant 0 : i32
    %c0_i32_0 = arith.constant 0 : i32
    %c0_i32_1 = arith.constant 0 : i32
    return %c0_i32, %c0_i32_0 : i32, i32
  }
  func.func @transform_6(%arg0: i32) -> (i32, i32) {
    %c0_i32 = arith.constant 0 : i32
    %c0_i32_0 = arith.constant 0 : i32
    %c0_i32_1 = arith.constant 0 : i32
    return %c0_i32, %c0_i32_0 : i32, i32
  }
  func.func @transform_7(%arg0: i32) -> (i32, i32) {
    %c0_i32 = arith.constant 0 : i32
    %c0_i32_0 = arith.constant 0 : i32
    %c0_i32_1 = arith.constant 0 : i32
    return %c0_i32, %c0_i32_0 : i32, i32
  }
  func.func @transform_8(%arg0: i32) -> (i32, i32) {
    %c0_i32 = arith.constant 0 : i32
    %c0_i32_0 = arith.constant 0 : i32
    %c0_i32_1 = arith.constant 0 : i32
    return %c0_i32, %c0_i32_0 : i32, i32
  }
  func.func @transform_9(%arg0: i32) -> (i32, i32) {
    %c0_i32 = arith.constant 0 : i32
    %c0_i32_0 = arith.constant 0 : i32
    %c0_i32_1 = arith.constant 0 : i32
    return %c0_i32, %c0_i32_0 : i32, i32
  }
  func.func @transform_10(%arg0: i32) -> (i32, i32) {
    %c0_i32 = arith.constant 0 : i32
    %c0_i32_0 = arith.constant 0 : i32
    %c0_i32_1 = arith.constant 0 : i32
    return %c0_i32, %c0_i32_0 : i32, i32
  }
  func.func @transform_11(%arg0: i32) -> (i32, i32) {
    %c0_i32 = arith.constant 0 : i32
    %c0_i32_0 = arith.constant 0 : i32
    %c0_i32_1 = arith.constant 0 : i32
    return %c0_i32, %c0_i32_0 : i32, i32
  }
  func.func @transform_12(%arg0: i32) -> (i32, i32) {
    %c0_i32 = arith.constant 0 : i32
    %c0_i32_0 = arith.constant 0 : i32
    %c0_i32_1 = arith.constant 0 : i32
    return %c0_i32, %c0_i32_0 : i32, i32
  }
  func.func @transform_13(%arg0: i32) -> (i32, i32) {
    %c0_i32 = arith.constant 0 : i32
    %c0_i32_0 = arith.constant 0 : i32
    %c0_i32_1 = arith.constant 0 : i32
    return %c0_i32, %c0_i32_0 : i32, i32
  }
  func.func @transform_14(%arg0: i32) -> (i32, i32) {
    %c0_i32 = arith.constant 0 : i32
    %c0_i32_0 = arith.constant 0 : i32
    %c0_i32_1 = arith.constant 0 : i32
    return %c0_i32, %c0_i32_0 : i32, i32
  }
  func.func @transform_15(%arg0: i32) -> (i32, i32, i32) {
    %c0_i32 = arith.constant 0 : i32
    %c0_i32_0 = arith.constant 0 : i32
    %c0_i32_1 = arith.constant 0 : i32
    return %arg0, %c0_i32, %c0_i32_0 : i32, i32, i32
  }
}

</mosaic_0001>

<bundles_post_ra>
// kernel: synthmix_pallas.1
= control target key start
LH: loop header
LB: loop body
LE: loop exit
PB: predicated region body
PF: predicated region fallthrough
CT: control target
= control target key end

     0   :  { %s7354_s0 = inlined_call_operand.vmem [shape: f32[8,16,32], index: 0, kind: input, shape index: {}]   ;;  %s7355_s1 = inlined_call_operand.vmem [shape: f32[32,24], index: 1, kind: input, shape index: {}]   ;;  %s7356_s2 = inlined_call_operand.vmem [shape: f32[1,24], index: 2, kind: input, shape index: {}]   ;;  %s7357_s3 = inlined_call_operand.vmem [shape: f32[16,24], index: 3, kind: input, shape index: {}]   ;;  %s7358_s4 = inlined_call_operand.vmem [shape: f32[1,24], index: 4, kind: input, shape index: {}]   ;;  %s7359_s5 = inlined_call_operand.vmem [shape: f32[4,16], index: 5, kind: input, shape index: {}]   ;;  %s7360_s6 = inlined_call_operand.vmem [shape: f32[16,4], index: 6, kind: input, shape index: {}]   ;;  %s7361_s7 = inlined_call_operand.vmem [shape: f32[8,32], index: 7, kind: input, shape index: {}]   ;;  %s7362_s8 = inlined_call_operand.vmem [shape: f32[32,8], index: 8, kind: input, shape index: {}]   ;;  %s7363_s9 = inlined_call_operand.vmem [shape: f32[4,16], index: 9, kind: input, shape index: {}]   ;;  %s7364_s10 = inlined_call_operand.vmem [shape: f32[4,1], index: 10, kind: input, shape index: {}]   ;;  %s7365_s11 = inlined_call_operand.vmem [shape: f32[32,4], index: 11, kind: input, shape index: {}]   ;;  %s7366_s12 = inlined_call_operand.vmem [shape: f32[32,1], index: 12, kind: input, shape index: {}]   ;;  %s7367_s13 = inlined_call_operand.vmem [shape: f32[32,32], index: 13, kind: input, shape index: {}]   ;;  %s7368_s14 = inlined_call_operand.vmem [shape: f32[1,32], index: 14, kind: input, shape index: {}]   ;;  %s7369_s15 = inlined_call_operand.hbm [shape: f32[8,16,32], index: 15, kind: output, shape index: {}]  }
   0x1   :  { %7373 = sst [smem:[#allocation8_spill]] %s7354_s0 }
   0x2   :  { %20 = vsyncpa [#allocation3], 0 }
   0x3   :  { %22 = vsyncpa [#allocation3 + $0x1], 0  ;;  %s6275_s18 = smov 0   ;;  %s6277_s19 = smov 0  }
   0x4   :  { %s6279_s20 = smov 0   ;;  %s6281_s21 = smov 0  }
   0x5 LB: > { %7374 = sst [smem:[#allocation5_spill]] %s6179_s20  ;;  %s6296_s22 = sadd.s32 4294967295, %s6183_s21   ;;  %s6183_s21 = sphi %s6281_s21, %s7384_s21   ;;  %s6179_s20 = sphi %s6279_s20, %s7386_s20   ;;  %s6175_s19 = sphi %s6277_s19, %s7388_s19   ;;  %s6171_s18 = sphi %s6275_s18, %s7387_s18  }
   0x6   : > { %s4899_s23 = sadd.s32 4294967294, %s6183_s21   ;;  %s6300_s24 = sadd.s32 1, %s6183_s21  }
   0x7   : > { %7375 = sst [smem:[#allocation6_spill]] %s6300_s24  ;;  %s355_s25 = sadd.s32 1, %s6179_s20 }
   0x8   : > { %s352_s26 = ssub.s32 %s6183_s21, %s6300_s24  ;;  %p365_p0 = scmp.ne.s32.totalorder %s6179_s20, %s6175_s19 }
   0x9   : > { %p353_p1 = scmp.eq.s32.totalorder %s352_s26, 0  ;;  %p366_p2 = scmp.eq.s32.totalorder %s6296_s22, 1 }
   0xa   : > { %p371_p3 = scmp.ne.s32.totalorder %s6175_s19, %s6171_s18  ;;  %p372_p4 = scmp.eq.s32.totalorder %s4899_s23, 1 }
   0xb   : > { %s6311_s27 = scalar_select %p353_p1, %s6179_s20, %s355_s25  }
   0xc   : > { %p6313_p5 = por %p366_p2, %p365_p0  ;;  %p6317_p6 = por %p372_p4, %p371_p3 }
   0xd   : > { %7376 = sst [smem:[#allocation7_spill]] %s6311_s27  ;;  %p4902_p7 = scmp.ge.s32.totalorder %s6183_s21, 1 }
   0xe   : > { %p442_p8 = scmp.lt.s32.totalorder %s6183_s21, 3 }
  0x10   : > { %p443_p9 = pnand %p4902_p7, %p442_p8 }
  0x11   : > { %v507_v0 = vld [vmem:[%s7355_s1] sm:$0xff] (!%p443_p9)  ;;  %v508_v1 = vld [vmem:[%s7355_s1 + $0x8] sm:$0xff] (!%p443_p9)  ;;  %v509_v2 = vld [vmem:[%s7355_s1 + $0x10] sm:$0xff] (!%p443_p9)  ;;  %s4904_s27 = sshll.u32 (!%p443_p9), %s6296_s22, 2  ;;  %vm518_vm0 = vcmask (!%p443_p9), 261120   ;;  %s7379_s0 = sld [smem:[#allocation8_spill]] (!%p443_p9) }
  0x12   : > { %446 = sbr.rel (%p443_p9) target bundleno = 3617 (0xe21), region = 80  ;;  %v5609_v3 = vpack.c.bf16 (!%p443_p9), %v508_v1, %v507_v0  ;;  %v510_v4 = vld [vmem:[%s7355_s1 + $0x18] sm:$0xff] (!%p443_p9)  ;;  %p492_p10 = scmp.lt.s32.totalorder (!%p443_p9), %s4904_s27, 7  ;;  %v4907_v14 = vld [vmem:[%s7356_s2] ss:$0 sm:$0xff] (!%p443_p9)  ;;  %vm979_vm1 = vcmask (!%p443_p9), 64512  }
  0x13   : > { %v5613_v5 = vpack.c.bf16 (!%p443_p9), %v510_v4, %v509_v2  ;;  %v776_v39 = vld [vmem:[%s7357_s3] sm:$0xff] (!%p443_p9)  ;;  %v777_v40 = vld [vmem:[%s7357_s3 + $0x8] sm:$0xff] (!%p443_p9)  ;;  %v6185_v42 = vmov (!%p443_p9), 0.0|0.0   ;;  %vm785_vm2 = vcmask (!%p443_p9), 130048   ;;  %vm6186_vm3 = vmmov (!%p443_p9), 0   ;;  %vm6571_vm6 = vmpackc.low (!%p443_p9), %vm979_vm1, %vm979_vm1  ;;  %s6190_s17 = smov (!%p443_p9), 120  }
  0x14   : > { %5610 = vmatprep.subr.bf16.mxu0 (!%p443_p9), %v5609_v3  ;;  %v5617_v41 = vpack.c.bf16 (!%p443_p9), %v777_v40, %v776_v39  ;;  %v6187_v58 = vmov (!%p443_p9), 0.0   ;;  %v1013_v59 = vld [vmem:[%s7359_s5] sm:$0xf] (!%p443_p9)  ;;  %vm1303_vm4 = vcmask (!%p443_p9), 31744   ;;  %vm1310_vm5 = vcmask (!%p443_p9), 1043456   ;;  %vm7010_vm7 = vmpackc.low (!%p443_p9), %vm785_vm2, %vm785_vm2  ;;  %s488_s20 = sand.u32 (!%p443_p9), 1, %s6175_s19  }
  0x15   : > { %5612 = vmatpush3.bf16.msra.mxu0 (!%p443_p9), %v5609_v3  ;;  %s4903_s24 = sshll.u32 (!%p443_p9), %s488_s20, 6  ;;  %s6192_s25 = smov (!%p443_p9), [#allocation2]  }
  0x16   : > { %5614 = vmatprep.subr.bf16.mxu0 (!%p443_p9), %v5613_v5  ;;  %5773 = vmatprep.subr.bf16.mxu1 (!%p443_p9), %v5617_v41  ;;  %s490_s26 = scalar_lea.vmem (!%p443_p9), [#allocation2], %s4903_s24 }
  0x17   : > { %5774 = vmatpush3.bf16.msra.mxu1 (!%p443_p9), %v5617_v41  ;;  %s4837_s16 = sshll.u32 (!%p443_p9), %s490_s26, 4  ;;  %s7307_s16 = int_to_ptr.vmem [resolvable:$true] %s4837_s16 }
  0x19   : > { %s7390_s27 = smov (!%p492_p10, %s4904_s27), 7  ;;  %5616 = vmatpush3.bf16.msra.mxu0 %v5613_v5 }
  0x1a   : > { %s5080_s30 = sshll.u32 %s7390_s27, 4  ;;  %5618 = vmatprep.subr.bf16.mxu0 %v5617_v41  ;;  %s6121_s27 = scalar_lea.vmem %s7307_s16, 1024 }
  0x1b   : > { %s496_s23 = scalar_lea.vmem %s7379_s0, %s5080_s30  ;;  %s6189_s30 = smov 112  }
  0x1c   : > { %v499_v6 = vld [vmem:[%s496_s23] sm:$0xff]  ;;  %v500_v7 = vld [vmem:[%s496_s23 + $0x8] sm:$0xff]  ;;  %v501_v8 = vld [vmem:[%s496_s23 + $0x10] sm:$0xff]  ;;  %p6122_p11 = scmp.ne.s32.totalorder %s7307_s16, %s6121_s27 }
  0x1d   : > { %5277 = vmatprep.mubr.msk.f32.mxu0 %vm518_vm0, %v499_v6  ;;  %v502_v9 = vld [vmem:[%s496_s23 + $0x18] sm:$0xff]  ;;  %v503_v10 = vld [vmem:[%s496_s23 + $0x20] sm:$0xff]  ;;  %v504_v11 = vld [vmem:[%s496_s23 + $0x28] sm:$0xff] }
  0x1e   : > { %5278 = vmatmul.mubr.msk.f32.vlgmr.msra.gmra.mrb[0].mxu0 %vm518_vm0, %v500_v7  ;;  %v505_v12 = vld [vmem:[%s496_s23 + $0x30] sm:$0xff]  ;;  %v506_v13 = vld [vmem:[%s496_s23 + $0x38] sm:$0xff]  ;;  %p6123_p12 = pnand %p6122_p11, %p6313_p5 }
  0x1f   : > { %5280 = vmatprep.mubr.msk.f32.mxu0 %vm518_vm0, %v501_v8  ;;  %5620 = vmatpush3.bf16.msra.mxu0 %v5617_v41 }
  0x20   : > { %5621 = vmatprep.subr.bf16.mxu0 %v6185_v42  ;;  %p6124_p13 = pneg %p6123_p12 }
  0x22   : > { %5281 = vmatmul.mubr.msk.f32.gmra.mrb[2].mxu0 %vm518_vm0, %v502_v9 }
  0x23   : > { %5283 = vmatprep.mubr.msk.f32.mxu0 %vm518_vm0, %v503_v10 }
  0x26   : > { %5284 = vmatmul.mubr.msk.f32.gmra.mrb[4].mxu0 %vm518_vm0, %v504_v11 }
  0x27   : > { %5286 = vmatprep.mubr.msk.f32.mxu0 %vm518_vm0, %v505_v12 }
  0x2a   : > { %5287 = vmatmul.mubr.msk.f32.gmra.mrb[6].mxu0 %vm518_vm0, %v506_v13 }
  0xf1   : > { %v5279_v15 = vpop.f32.mrb[0].mxu0 }
  0xf2   : > { %v6350_v16 = vadd.f32 %v5279_v15, %v4907_v14  ;;  %v609_v17 = vpop.f32.mrb[1].mxu0 }
  0xf3   : > { %v6352_v18 = vadd.f32 %v4907_v14, %v609_v17 }
  0xf4   : > { %v983_v19 = vsel %vm979_vm1, %v6350_v16, 0.0 }
  0xf5   : > { %984 = vadd.xlane.f32.xlu0 %v983_v19  ;;  %v5282_v20 = vpop.f32.mrb[2].mxu0  ;;  %v980_v23 = vsel %vm979_vm1, %v6352_v18, 0.0  ;;  %v1301_v19 = vld [vmem:[%s7360_s6] sm:$0xff] }
  0xf6   : > { %v619_v21 = vpop.f32.mrb[3].mxu0  ;;  %v6360_v24 = vadd.f32 %v5282_v20, %v4907_v14 }
  0xf7   : > { %v6356_v22 = vadd.f32 %v4907_v14, %v619_v21 }
  0xf8   : > { %v989_v31 = vsel %vm979_vm1, %v6360_v24, 0.0 }
  0xf9   : > { %v5285_v25 = vpop.f32.mrb[4].mxu0  ;;  %981 = vadd.xlane.f32.xlu0 %v980_v23  ;;  %v986_v26 = vsel %vm979_vm1, %v6356_v22, 0.0 }
  0xfa   : > { %v629_v27 = vpop.f32.mrb[5].mxu0  ;;  %987 = vadd.xlane.f32.xlu1 %v986_v26  ;;  %v6366_v29 = vadd.f32 %v5285_v25, %v4907_v14 }
  0xfb   : > { %v6364_v28 = vadd.f32 %v4907_v14, %v629_v27  ;;  %v1302_v27 = vld [vmem:[%s7360_s6 + $0x8] sm:$0xff] }
  0xfc   : > { %v995_v36 = vsel %vm979_vm1, %v6366_v29, 0.0 }
  0xfd   : > { %v5288_v30 = vpop.f32.mrb[6].mxu0  ;;  %v992_v32 = vsel %vm979_vm1, %v6364_v28, 0.0 }
  0xfe   : > { %v639_v33 = vpop.f32.mrb[7].mxu0  ;;  %990 = vadd.xlane.f32.xlu1 %v989_v31  ;;  %993 = vadd.xlane.f32.xlu0 %v992_v32  ;;  %v6374_v35 = vadd.f32 %v5288_v30, %v4907_v14 }
  0xff   : > { %v6372_v34 = vadd.f32 %v4907_v14, %v639_v33 }
 0x100   : > { %v1001_v38 = vsel %vm979_vm1, %v6374_v35, 0.0 }
 0x101   : > { %v998_v37 = vsel %vm979_vm1, %v6372_v34, 0.0 }
 0x102   : > { %996 = vadd.xlane.f32.xlu1 %v995_v36  ;;  %999 = vadd.xlane.f32.xlu0 %v998_v37 }
 0x106   : > { %1002 = vadd.xlane.f32.xlu1 %v1001_v38 }
 0x12f   : > { %648 = vxpose.xlu0.b32.start [1/2] (short) (narrow) %v499_v6, 32 }
 0x133   : > { %649 = vxpose.xlu0.b32.end [2/2] (short) (narrow) %v500_v7, 32 }
 0x139   : > { %680 = vxpose.xlu1.b32.start [1/2] (short) (narrow) %v501_v8, 32 }
 0x13c   : > { %712 = vxpose.xlu0.b32.start [1/2] (short) (narrow) %v503_v10, 32 }
 0x13d   : > { %681 = vxpose.xlu1.b32.end [2/2] (short) (narrow) %v502_v9, 32 }
 0x140   : > { %713 = vxpose.xlu0.b32.end [2/2] (short) (narrow) %v504_v11, 32 }
 0x146   : > { %744 = vxpose.xlu1.b32.start [1/2] (short) (narrow) %v505_v12, 32 }
 0x14a   : > { %745 = vxpose.xlu1.b32.end [2/2] (short) (narrow) %v506_v13, 32 }
 0x182   : > { %v985_v43 = vpop.xlane.xlu0 %984 }
 0x183   : > { %v1006_v52 = vmul.f32 0.125, %v985_v43 }
 0x186   : > { %v982_v44 = vpop.xlane.xlu0 %981 }
 0x187   : > { %v988_v45 = vpop.xlane.xlu1 %987  ;;  %v1005_v49 = vmul.f32 0.125, %v982_v44 }
 0x188   : > { %v1007_v56 = vmul.f32 0.125, %v988_v45 }
 0x189   : > { %v5622_v53 = vpack.c.bf16 %v1006_v52, %v1005_v49 }
 0x18b   : > { %v994_v46 = vpop.xlane.xlu0 %993  ;;  %v991_v47 = vpop.xlane.xlu1 %990 }
 0x18c   : > { %v1008_v54 = vmul.f32 0.125, %v991_v47  ;;  %v1009_v63 = vmul.f32 0.125, %v994_v46 }
 0x18e   : > { %v5625_v60 = vpack.c.bf16 %v1008_v54, %v1007_v56  ;;  %v6188_v56 = vmov 0  }
 0x18f   : > { %v1000_v48 = vpop.xlane.xlu0 %999  ;;  %v997_v50 = vpop.xlane.xlu1 %996  ;;  %5824 = vset.pattern.permute.xlu1 %v6188_v56  ;;  %5823 = vset.pattern.permute.xlu0 %v6188_v56 }
 0x190   : > { %v1010_v61 = vmul.f32 0.125, %v997_v50  ;;  %v1011_v4 = vmul.f32 0.125, %v1000_v48 }
 0x192   : > { %v5628_v1 = vpack.c.bf16 %v1010_v61, %v1009_v63 }
 0x193   : > { %v1003_v57 = vpop.xlane.xlu1 %1002 }
 0x194   : > { %v1012_v2 = vmul.f32 0.125, %v1003_v57 }
 0x196   : > { %v5631_v6 = vpack.c.bf16 %v1012_v2, %v1011_v4 }
 0x1af   : > { %v664_v51 = vpop.trf.xlu0 }
 0x1b0   : > { %5293 = vmatprep.mubr.msk.f32.mxu0 %vm785_vm2, %v664_v51 }
 0x1b3   : > { %v665_v55 = vpop.trf.xlu0 }
 0x1b4   : > { %5294 = vmatmul.mubr.msk.f32.vlgmr.msra.gmra.mrb[8].mxu0 %vm785_vm2, %v665_v55 }
 0x1b5   : > { %5623 = vmatpush3.bf16.msra.mxu0 %v5622_v53  ;;  %5321 = vmatprep.mubr.msk.f32.mxu0 %vm6186_vm3, %v6187_v58 }
 0x1b6   : > { %5624 = vmatprep.subr.bf16.mxu0 %v6185_v42 }
 0x1b7   : > { %v666_v62 = vpop.trf.xlu0 }
 0x1b8   : > { %5322 = vmatmul.mubr.msk.f32.vlgmr.msra.gmra.mrb[10].mxu0 %vm785_vm2, %v1013_v59  ;;  %5296 = vmatprep.mubr.msk.f32.mxu1 %vm785_vm2, %v666_v62 }
 0x1b9   : > { %5626 = vmatpush3.bf16.msra.mxu0 %v5625_v60  ;;  %5328 = vmatprep.mubr.msk.f32.mxu0 %vm6186_vm3, %v6187_v58  ;;  %v696_v0 = vpop.trf.xlu1 }
 0x1ba   : > { %5627 = vmatprep.subr.bf16.mxu0 %v6185_v42 }
 0x1bb   : > { %v667_v3 = vpop.trf.xlu0 }
 0x1bc   : > { %5329 = vmatmul.mubr.msk.f32.vlgmr.msra.gmra.mrb[12].mxu0 %vm785_vm2, %v1013_v59  ;;  %5297 = vmatmul.mubr.msk.f32.vlgmr.msra.gmra.mrb[0].mxu1 %vm785_vm2, %v667_v3 }
 0x1bd   : > { %5629 = vmatpush3.bf16.msra.mxu0 %v5628_v1  ;;  %5335 = vmatprep.mubr.msk.f32.mxu0 %vm6186_vm3, %v6187_v58  ;;  %v697_v5 = vpop.trf.xlu1 }
 0x1be   : > { %5630 = vmatprep.subr.bf16.mxu0 %v6185_v42  ;;  %5299 = vmatprep.mubr.msk.f32.mxu1 %vm785_vm2, %v696_v0 }
 0x1bf   : > { %v728_v7 = vpop.trf.xlu0 }
 0x1c0   : > { %5336 = vmatmul.mubr.msk.f32.vlgmr.msra.gmra.mrb[14].mxu0 %vm785_vm2, %v1013_v59  ;;  %5300 = vmatmul.mubr.msk.f32.gmra.mrb[2].mxu1 %vm785_vm2, %v697_v5 }
 0x1c1   : > { %5632 = vmatpush3.bf16.msra.mxu0 %v5631_v6  ;;  %5342 = vmatprep.mubr.msk.f32.mxu0 %vm6186_vm3, %v6187_v58  ;;  %v698_v8 = vpop.trf.xlu1 }
 0x1c2   : > { %5302 = vmatprep.mubr.msk.f32.mxu1 %vm785_vm2, %v698_v8 }
 0x1c3   : > { %v729_v9 = vpop.trf.xlu0 }
 0x1c4   : > { %5343 = vmatmul.mubr.msk.f32.vlgmr.msra.gmra.mrb[16].mxu0 %vm785_vm2, %v1013_v59 }
 0x1c5   : > { %v699_v10 = vpop.trf.xlu1  ;;  %5352 = vmatprep.mubr.msk.f32.mxu0 %vm1303_vm4, %v1301_v19 }
 0x1c6   : > { %5303 = vmatmul.mubr.msk.f32.gmra.mrb[4].mxu1 %vm785_vm2, %v699_v10 }
 0x1c7   : > { %5305 = vmatprep.mubr.msk.f32.mxu1 %vm785_vm2, %v728_v7  ;;  %v730_v11 = vpop.trf.xlu0 }
 0x1c9   : > { %v760_v12 = vpop.trf.xlu1 }
 0x1ca   : > { %5306 = vmatmul.mubr.msk.f32.gmra.mrb[6].mxu1 %vm785_vm2, %v729_v9 }
 0x1cb   : > { %5308 = vmatprep.mubr.msk.f32.mxu1 %vm785_vm2, %v730_v11  ;;  %v731_v13 = vpop.trf.xlu0 }
 0x1cd   : > { %v761_v14 = vpop.trf.xlu1 }
 0x1ce   : > { %5309 = vmatmul.mubr.msk.f32.gmra.mrb[8].mxu1 %vm785_vm2, %v731_v13 }
 0x1cf   : > { %5311 = vmatprep.mubr.msk.f32.mxu1 %vm785_vm2, %v760_v12 }
 0x1d1   : > { %v762_v15 = vpop.trf.xlu1 }
 0x1d2   : > { %5312 = vmatmul.mubr.msk.f32.gmra.mrb[10].mxu1 %vm785_vm2, %v761_v14 }
 0x1d3   : > { %5314 = vmatprep.mubr.msk.f32.mxu1 %vm785_vm2, %v762_v15 }
 0x1d5   : > { %v763_v17 = vpop.trf.xlu1 }
 0x1d6   : > { %5315 = vmatmul.mubr.msk.f32.gmra.mrb[12].mxu1 %vm785_vm2, %v763_v17 }
 0x1d7   : > { %5347 = vmatprep.mubr.msk.f32.mxu1 %vm1303_vm4, %v1301_v19 }
 0x287   : > { %v6428_v20 = vpop.f32.mrb[8].mxu0 }
 0x288   : > { %v6430_v21 = vpop.f32.mrb[9].mxu0 }
 0x28b   : > { %v1083_v23 = vpop.f32.mrb[10].mxu0 }
 0x28c   : > { %v1297_v25 = vmax.f32 %v1083_v23, 0.0  ;;  %v5323_v26 = vpop.f32.mrb[11].mxu0 }
 0x28e   : > { %5345 = vmatprep.subr.msk.mxu1 %vm1310_vm5, %v1297_v25 }
 0x28f   : > { %v1153_v30 = vpop.f32.mrb[12].mxu0  ;;  %5346 = vmatpush3.msk.msra.mxu1 %vm1310_vm5, %v1297_v25  ;;  %v6437_v31 = vpop.f32.mrb[0].mxu1 }
 0x290   : > { %v1298_v32 = vmax.f32 %v1153_v30, 0.0  ;;  %5348 = vmatmul.mubr.msk.f32.vlgmr.msra.gmra.mrb[14].mxu1 %vm1303_vm4, %v1302_v27  ;;  %v5330_v33 = vpop.f32.mrb[13].mxu0  ;;  %v6440_v36 = vpop.f32.mrb[1].mxu1 }
 0x291   : > { %5357 = vmatprep.mubr.msk.f32.mxu1 %vm1303_vm4, %v1301_v19 }
 0x292   : > { %5350 = vmatprep.subr.msk.mxu0 %vm1310_vm5, %v1298_v32 }
 0x293   : > { %v1223_v37 = vpop.f32.mrb[14].mxu0  ;;  %5351 = vmatpush3.msk.msra.mxu0 %vm1310_vm5, %v1298_v32  ;;  %v6445_v38 = vpop.f32.mrb[2].mxu1 }
 0x294   : > { %v1299_v39 = vmax.f32 %v1223_v37, 0.0  ;;  %5353 = vmatmul.mubr.msk.f32.vlgmr.msra.gmra.mrb[18].mxu0 %vm1303_vm4, %v1302_v27  ;;  %v5337_v40 = vpop.f32.mrb[15].mxu0  ;;  %v6448_v41 = vpop.f32.mrb[3].mxu1 }
 0x295   : > { %5362 = vmatprep.mubr.msk.f32.mxu0 %vm1303_vm4, %v1301_v19 }
 0x296   : > { %5355 = vmatprep.subr.msk.mxu1 %vm1310_vm5, %v1299_v39 }
 0x297   : > { %v1293_v43 = vpop.f32.mrb[16].mxu0  ;;  %5356 = vmatpush3.msk.msra.mxu1 %vm1310_vm5, %v1299_v39 }
 0x298   : > { %v1300_v44 = vmax.f32 %v1293_v43, 0.0  ;;  %5358 = vmatmul.mubr.msk.f32.vlgmr.msra.gmra.mrb[16].mxu1 %vm1303_vm4, %v1302_v27  ;;  %v5344_v45 = vpop.f32.mrb[17].mxu0 }
 0x299   : > { %v6454_v46 = vpop.f32.mrb[4].mxu1 }
 0x29a   : > { %5360 = vmatprep.subr.msk.mxu0 %vm1310_vm5, %v1300_v44  ;;  %v6457_v47 = vpop.f32.mrb[5].mxu1 }
 0x29b   : > { %5361 = vmatpush3.msk.msra.mxu0 %vm1310_vm5, %v1300_v44 }
 0x29c   : > { %5363 = vmatmul.mubr.msk.f32.vlgmr.msra.gmra.mrb[20].mxu0 %vm1303_vm4, %v1302_v27 }
 0x29d   : > { %v6461_v48 = vpop.f32.mrb[6].mxu1 }
 0x29e   : > { %v6463_v49 = vpop.f32.mrb[7].mxu1 }
 0x2a1   : > { %v6465_v50 = vpop.f32.mrb[8].mxu1 }
 0x2a2   : > { %v6467_v51 = vpop.f32.mrb[9].mxu1 }
 0x2a5   : > { %v6469_v52 = vpop.f32.mrb[10].mxu1 }
 0x2a6   : > { %v6471_v53 = vpop.f32.mrb[11].mxu1 }
 0x2a9   : > { %v6473_v54 = vpop.f32.mrb[12].mxu1 }
 0x2aa   : > { %v6475_v55 = vpop.f32.mrb[13].mxu1 }
 0x363   : > { %v5349_v57 = vpop.f32.mrb[14].mxu1 }
 0x364   : > { %v4950_v59 = vmul.f32 -1.442695, %v5349_v57  ;;  %v1380_v60 = vpop.f32.mrb[15].mxu1  ;;  %v6480_v57 = vld [vmem:[%s7358_s4] ss:$0 sm:$0xff] }
 0x365   : > { %v4949_v61 = vmul.f32 -1.442695, %v1380_v60  ;;  %v6484_v60 = vadd.f32 %v6428_v20, %v6480_v57  ;;  %v6504_v20 = vadd.f32 %v6480_v57, %v6440_v36 }
 0x366   : > { %5865 = vpow2.f32 %v4950_v59 }
 0x367   : > { %5867 = vpow2.f32 %v4949_v61  ;;  %v5354_v62 = vpop.f32.mrb[18].mxu0  ;;  %v6488_v61 = vadd.f32 %v6480_v57, %v6430_v21 }
 0x368   : > { %v4952_v63 = vmul.f32 -1.442695, %v5354_v62  ;;  %v1458_v0 = vpop.f32.mrb[19].mxu0 }
 0x369   : > { %v4951_v1 = vmul.f32 -1.442695, %v1458_v0  ;;  %v6496_v0 = vadd.f32 %v6480_v57, %v6448_v41  ;;  %v5825_v21 = vpack.i.bf16 %v6484_v60, %v6488_v61  ;;  %v6514_v41 = vadd.f32 %v6461_v48, %v6480_v57 }
 0x36a   : > { %5869 = vpow2.f32 %v4952_v63  ;;  %v6492_v63 = vadd.f32 %v6445_v38, %v6480_v57 }
 0x36b   : > { %5871 = vpow2.f32 %v4951_v1  ;;  %v5359_v2 = vpop.f32.mrb[16].mxu1  ;;  %v6500_v1 = vadd.f32 %v6437_v31, %v6480_v57  ;;  %v6518_v31 = vadd.f32 %v6480_v57, %v6463_v49 }
 0x36c   : > { %v4954_v3 = vmul.f32 -1.442695, %v5359_v2  ;;  %v1536_v4 = vpop.f32.mrb[17].mxu1  ;;  %v5830_v38 = vpack.i.bf16 %v6492_v63, %v6496_v0 }
 0x36d   : > { %v4953_v5 = vmul.f32 -1.442695, %v1536_v4  ;;  %v5835_v36 = vpack.i.bf16 %v6500_v1, %v6504_v20  ;;  %v5845_v2 = vpack.i.bf16 %v6514_v41, %v6518_v31 }
 0x36e   : > { %5873 = vpow2.f32 %v4954_v3  ;;  %v2214_v3 = vsel %vm785_vm2, %v6484_v60, 0.0 }
 0x36f   : > { %5875 = vpow2.f32 %v4953_v5  ;;  %v5364_v6 = vpop.f32.mrb[20].mxu0 }
 0x370   : > { %v5866_v7 = vpop.eup %5865  ;;  %v4956_v8 = vmul.f32 -1.442695, %v5364_v6  ;;  %v1614_v9 = vpop.f32.mrb[21].mxu0 }
 0x371   : > { %v5868_v10 = vpop.eup %5867  ;;  %v1648_v11 = vadd.f32 1.0, %v5866_v7  ;;  %v4955_v12 = vmul.f32 -1.442695, %v1614_v9 }
 0x372   : > { %v1647_v13 = vadd.f32 1.0, %v5868_v10  ;;  %5877 = vpow2.f32 %v4956_v8 }
 0x373   : > { %5879 = vrcp.f32 %v1648_v11 }
 0x374   : > { %v5870_v14 = vpop.eup %5869  ;;  %5881 = vrcp.f32 %v1647_v13 }
 0x375   : > { %v5872_v15 = vpop.eup %5871  ;;  %v1650_v17 = vadd.f32 1.0, %v5870_v14  ;;  %5883 = vpow2.f32 %v4955_v12 }
 0x376   : > { %v1649_v19 = vadd.f32 1.0, %v5872_v15 }
 0x377   : > { %5885 = vrcp.f32 %v1650_v17 }
 0x378   : > { %v5874_v23 = vpop.eup %5873  ;;  %5887 = vrcp.f32 %v1649_v19  ;;  %v6553_v19 = vadd.f32 %v6454_v46, %v6480_v57 }
 0x379   : > { %v5876_v25 = vpop.eup %5875  ;;  %v1652_v26 = vadd.f32 1.0, %v5874_v23  ;;  %v6557_v23 = vadd.f32 %v6480_v57, %v6457_v47 }
 0x37a   : > { %v1651_v27 = vadd.f32 1.0, %v5876_v25 }
 0x37c   : > { %v5878_v30 = vpop.eup %5877  ;;  %5889 = vrcp.f32 %v1651_v27 }
 0x37d   : > { %v5880_v32 = vpop.eup %5879  ;;  %5891 = vrcp.f32 %v1652_v26  ;;  %v1654_v33 = vadd.f32 1.0, %v5878_v30 }
 0x37e   : > { %v5882_v37 = vpop.eup %5881  ;;  %1678 = vperm.xlu1 %5824, %v5880_v32  }
 0x37f   : > { %v5884_v39 = vpop.eup %5883  ;;  %1673 = vperm.xlu0 %5823, %v5882_v37   ;;  %5893 = vrcp.f32 %v1654_v33  ;;  %v5840_v33 = vpack.i.bf16 %v6553_v19, %v6557_v23 }
 0x380   : > { %v1653_v40 = vadd.f32 1.0, %v5884_v39 }
 0x381   : > { %v5886_v43 = vpop.eup %5885 }
 0x382   : > { %5895 = vrcp.f32 %v1653_v40  ;;  %1688 = vperm.xlu1 %5824, %v5886_v43   ;;  %v5888_v44 = vpop.eup %5887 }
 0x386   : > { %v5890_v45 = vpop.eup %5889  ;;  %1683 = vperm.xlu1 %5824, %v5888_v44  }
 0x387   : > { %v5892_v56 = vpop.eup %5891  ;;  %1693 = vperm.xlu0 %5823, %v5890_v45  }
 0x389   : > { %v5894_v59 = vpop.eup %5893 }
 0x38a   : > { %1698 = vperm.xlu1 %5824, %v5892_v56  }
 0x38c   : > { %v5896_v62 = vpop.eup %5895 }
 0x38d   : > { %1703 = vperm.xlu0 %5823, %v5896_v62  }
 0x38e   : > { %1708 = vperm.xlu1 %5824, %v5894_v59  }
 0x391   : > { %5826 = vrot.lane.b32.xlu0 %v5825_v21, %s6189_s30 }
 0x392   : > { %5831 = vrot.lane.b32.xlu1 %v5830_v38, %s6189_s30 }
 0x395   : > { %5836 = vrot.lane.b32.xlu0 %v5835_v36, %s6189_s30 }
 0x399   : > { %5846 = vrot.lane.b32.xlu0 %v5845_v2, %s6189_s30 }
 0x3b8   : > { %2215 = vadd.xlane.f32.xlu0 %v2214_v3 }
 0x3fd   : > { %v1679_v48 = vpop.permute.xlu1 %1678 }
 0x3fe   : > { %v6529_v4 = vmul.f32 %v1679_v48, %v6350_v16  ;;  %v1674_v49 = vpop.permute.xlu0 %1673 }
 0x3ff   : > { %v6532_v5 = vmul.f32 %v1674_v49, %v6352_v18  ;;  %v6594_v49 = vadd.f32 %v6469_v52, %v6480_v57 }
 0x400   : > { %v1722_v6 = vsel %vm979_vm1, %v6529_v4, -inf }
 0x401   : > { %v1689_v7 = vpop.permute.xlu1 %1688  ;;  %1723 = vmax.xlane.f32.xlu1 %v1722_v6  ;;  %v1719_v8 = vsel %vm979_vm1, %v6532_v5, -inf  ;;  %v6598_v6 = vadd.f32 %v6480_v57, %v6471_v53 }
 0x402   : > { %v6539_v9 = vmul.f32 %v1689_v7, %v6360_v24  ;;  %1720 = vmax.xlane.f32.xlu0 %v1719_v8 }
 0x403   : > { %v5850_v7 = vpack.i.bf16 %v6594_v49, %v6598_v6 }
 0x404   : > { %v1728_v10 = vsel %vm979_vm1, %v6539_v9, -inf }
 0x405   : > { %v1684_v11 = vpop.permute.xlu1 %1683 }
 0x406   : > { %v6544_v12 = vmul.f32 %v1684_v11, %v6356_v22  ;;  %1729 = vmax.xlane.f32.xlu0 %v1728_v10  ;;  %v1694_v13 = vpop.permute.xlu0 %1693  ;;  %v2211_v10 = vsel %vm785_vm2, %v6488_v61, 0.0 }
 0x407   : > { %v6549_v15 = vmul.f32 %v1694_v13, %v6364_v28  ;;  %v2217_v13 = vsel %vm785_vm2, %v6504_v20, 0.0 }
 0x408   : > { %v1725_v14 = vsel %vm979_vm1, %v6544_v12, -inf }
 0x409   : > { %v1699_v17 = vpop.permute.xlu1 %1698  ;;  %v1731_v30 = vsel %vm979_vm1, %v6549_v15, -inf }
 0x40a   : > { %1726 = vmax.xlane.f32.xlu0 %v1725_v14  ;;  %v6604_v8 = vmul.f32 %v1699_v17, %v6366_v29  ;;  %v2220_v14 = vsel %vm785_vm2, %v6500_v1, 0.0  ;;  %v2223_v17 = vsel %vm785_vm2, %v6496_v0, 0.0 }
 0x40c   : > { %v1704_v25 = vpop.permute.xlu0 %1703  ;;  %v1734_v52 = vsel %vm979_vm1, %v6604_v8, -inf }
 0x40d   : > { %v6560_v26 = vmul.f32 %v1704_v25, %v6372_v34  ;;  %v1709_v27 = vpop.permute.xlu1 %1708  ;;  %v2226_v25 = vsel %vm785_vm2, %v6492_v63, 0.0 }
 0x40e   : > { %1732 = vmax.xlane.f32.xlu0 %v1731_v30  ;;  %v6609_v11 = vmul.f32 %v1709_v27, %v6374_v35 }
 0x40f   : > { %v1737_v47 = vsel %vm979_vm1, %v6560_v26, -inf }
 0x410   : > { %v5827_v32 = vpop.permute.xlu0 %5826  ;;  %v1740_v53 = vsel %vm979_vm1, %v6609_v11, -inf }
 0x411   : > { %v5829_v37 = vunpack.i.h.bf16 %v5827_v32  ;;  %v5828_v46 = vunpack.i.l.bf16 %v5827_v32  ;;  %v5832_v39 = vpop.permute.xlu1 %5831 }
 0x412   : > { %v5834_v40 = vunpack.i.h.bf16 %v5832_v39  ;;  %v5833_v43 = vunpack.i.l.bf16 %v5832_v39  ;;  %5841 = vrot.lane.b32.xlu1 %v5840_v33, %s6189_s30  ;;  %1738 = vmax.xlane.f32.xlu0 %v1737_v47 }
 0x413   : > { %v5633_v45 = vpack.c.bf16 %v5829_v37, %v5828_v46 }
 0x414   : > { %v5645_v56 = vpack.c.bf16 %v5834_v40, %v5833_v43  ;;  %v5837_v59 = vpop.permute.xlu0 %5836 }
 0x415   : > { %v5839_v62 = vunpack.i.h.bf16 %v5837_v59  ;;  %v5838_v21 = vunpack.i.l.bf16 %v5837_v59  ;;  %5635 = vmatprep.subr.msk.bf16.mxu1 %vm6571_vm6, %v5633_v45 }
 0x416   : > { %5638 = vmatpush3.bf16.xpose.msk.msra.mxu1 %vm6571_vm6, %v5633_v45  ;;  %5647 = vmatprep.subr.msk.bf16.mxu0 %vm6571_vm6, %v5645_v56 }
 0x417   : > { %v5639_v38 = vpack.c.bf16 %v5839_v62, %v5838_v21  ;;  %5650 = vmatpush3.bf16.xpose.msk.msra.mxu0 %vm6571_vm6, %v5645_v56 }
 0x418   : > { %v5847_v36 = vpop.permute.xlu0 %5846 }
 0x419   : > { %v5849_v2 = vunpack.i.h.bf16 %v5847_v36  ;;  %v5848_v3 = vunpack.i.l.bf16 %v5847_v36  ;;  %5641 = vmatprep.subr.msk.bf16.mxu1 %vm6571_vm6, %v5639_v38 }
 0x41b   : > { %v6585_v48 = vpack.c.bf16 %v5849_v2, %v5848_v3 }
 0x41e   : > { %5644 = vmatpush3.bf16.xpose.msk.msra.mxu1 %vm6571_vm6, %v5639_v38 }
 0x41f   : > { %5659 = vmatprep.subr.msk.bf16.mxu1 %vm6571_vm6, %v6585_v48 }
 0x428   : > { %5851 = vrot.lane.b32.xlu0 %v5850_v7, %s6189_s30 }
 0x436   : > { %2212 = vadd.xlane.f32.xlu1 %v2211_v10 }
 0x43a   : > { %1735 = vmax.xlane.f32.xlu1 %v1734_v52 }
 0x43e   : > { %1741 = vmax.xlane.f32.xlu1 %v1740_v53  ;;  %v2229_v53 = vsel %vm785_vm2, %v6557_v23, 0.0 }
 0x442   : > { %2218 = vadd.xlane.f32.xlu1 %v2217_v13 }
 0x445   : > { %v6623_v27 = vpop.xlane.xlu0 %2215 }
 0x446   : > { %2221 = vadd.xlane.f32.xlu1 %v2220_v14 }
 0x44a   : > { %2224 = vadd.xlane.f32.xlu1 %v2223_v17 }
 0x44e   : > { %2227 = vadd.xlane.f32.xlu1 %v2226_v25 }
 0x48e   : > { %v1724_v30 = vpop.xlane.xlu1 %1723 }
 0x48f   : > { %v1744_v32 = vsub.f32 %v6529_v4, %v1724_v30  ;;  %v1721_v33 = vpop.xlane.xlu0 %1720 }
 0x490   : > { %v1743_v37 = vsub.f32 %v6532_v5, %v1721_v33  ;;  %v6662_v33 = vadd.f32 %v6480_v57, %v6467_v51 }
 0x491   : > { %v1753_v46 = vmul.f32 1.442695, %v1744_v32  ;;  %v6658_v32 = vadd.f32 %v6465_v50, %v6480_v57 }
 0x492   : > { %v1751_v39 = vmul.f32 1.442695, %v1743_v37  ;;  %v5842_v47 = vpop.permute.xlu1 %5841 }
 0x493   : > { %5897 = vpow2.f32 %v1753_v46  ;;  %v5844_v40 = vunpack.i.h.bf16 %v5842_v47  ;;  %v5843_v43 = vunpack.i.l.bf16 %v5842_v47  ;;  %v1730_v45 = vpop.xlane.xlu0 %1729  ;;  %v5855_v37 = vpack.i.bf16 %v6658_v32, %v6662_v33 }
 0x494   : > { %5899 = vpow2.f32 %v1751_v39  ;;  %v1746_v56 = vsub.f32 %v6539_v9, %v1730_v45 }
 0x495   : > { %v5651_v59 = vpack.c.bf16 %v5844_v40, %v5843_v43 }
 0x496   : > { %v1757_v62 = vmul.f32 1.442695, %v1746_v56 }
 0x497   : > { %5653 = vmatprep.subr.msk.bf16.mxu0 %vm6571_vm6, %v5651_v59  ;;  %v1727_v21 = vpop.xlane.xlu0 %1726 }
 0x498   : > { %5901 = vpow2.f32 %v1757_v62  ;;  %v1745_v4 = vsub.f32 %v6544_v12, %v1727_v21  ;;  %5656 = vmatpush3.bf16.xpose.msk.msra.mxu0 %vm6571_vm6, %v5651_v59 }
 0x49a   : > { %v1755_v5 = vmul.f32 1.442695, %v1745_v4 }
 0x49b   : > { %v1733_v38 = vpop.xlane.xlu0 %1732 }
 0x49c   : > { %5903 = vpow2.f32 %v1755_v5  ;;  %v1747_v46 = vsub.f32 %v6549_v15, %v1733_v38 }
 0x49d   : > { %v6633_v36 = vpop.eup %5897 }
 0x49e   : > { %v6635_v2 = vpop.eup %5899  ;;  %v1770_v9 = vsel %vm979_vm1, %v6633_v36, 0.0  ;;  %v1759_v47 = vmul.f32 1.442695, %v1747_v46 }
 0x49f   : > { %1771 = vadd.xlane.f32.xlu1 %v1770_v9  ;;  %v1739_v3 = vpop.xlane.xlu0 %1738  ;;  %v1767_v7 = vsel %vm979_vm1, %v6635_v2, 0.0  ;;  %v2232_v9 = vsel %vm785_vm2, %v6553_v19, 0.0 }
 0x4a0   : > { %1768 = vadd.xlane.f32.xlu0 %v1767_v7  ;;  %5905 = vpow2.f32 %v1759_v47  ;;  %v1749_v50 = vsub.f32 %v6560_v26, %v1739_v3  ;;  %v6693_v3 = vadd.f32 %v6473_v54, %v6480_v57  ;;  %v6697_v7 = vadd.f32 %v6480_v57, %v6475_v55 }
 0x4a1   : > { %v2244_v54 = vsel %vm785_vm2, %v6658_v32, 0.0  ;;  %v2247_v55 = vsel %vm785_vm2, %v6598_v6, 0.0  ;;  %v2250_v57 = vsel %vm785_vm2, %v6594_v49, 0.0 }
 0x4a2   : > { %v6641_v12 = vpop.eup %5901  ;;  %v1763_v62 = vmul.f32 1.442695, %v1749_v50 }
 0x4a3   : > { %v5852_v10 = vpop.permute.xlu0 %5851  ;;  %v1776_v52 = vsel %vm979_vm1, %v6641_v12, 0.0 }
 0x4a4   : > { %v5854_v13 = vunpack.i.h.bf16 %v5852_v10  ;;  %v5853_v14 = vunpack.i.l.bf16 %v5852_v10  ;;  %1777 = vadd.xlane.f32.xlu1 %v1776_v52  ;;  %2230 = vadd.xlane.f32.xlu0 %v2229_v53  ;;  %v2235_v10 = vsel %vm785_vm2, %v6518_v31, 0.0  ;;  %v2241_v52 = vsel %vm785_vm2, %v6662_v33, 0.0 }
 0x4a5   : > { %v5860_v53 = vpack.i.bf16 %v6693_v3, %v6697_v7 }
 0x4a6   : > { %v6647_v17 = vpop.eup %5903  ;;  %v6649_v25 = vpack.c.bf16 %v5854_v13, %v5853_v14  ;;  %v2253_v13 = vsel %vm785_vm2, %v6697_v7, 0.0  ;;  %v2256_v14 = vsel %vm785_vm2, %v6693_v3, 0.0 }
 0x4a7   : > { %v1773_v30 = vsel %vm979_vm1, %v6647_v17, 0.0 }
 0x4a8   : > { %1774 = vadd.xlane.f32.xlu0 %v1773_v30  ;;  %5671 = vmatprep.subr.msk.bf16.mxu0 %vm6571_vm6, %v6649_v25  ;;  %v2238_v30 = vsel %vm785_vm2, %v6514_v41, 0.0 }
 0x4aa   : > { %v6673_v21 = vpop.eup %5905 }
 0x4b5   : > { %5856 = vrot.lane.b32.xlu1 %v5855_v37, %s6189_s30 }
 0x4c3   : > { %v6668_v39 = vpop.xlane.xlu1 %2212 }
 0x4c7   : > { %v1736_v40 = vpop.xlane.xlu1 %1735 }
 0x4c8   : > { %v1748_v43 = vsub.f32 %v6604_v8, %v1736_v40  ;;  %v1779_v8 = vsel %vm979_vm1, %v6673_v21, 0.0 }
 0x4ca   : > { %v1761_v45 = vmul.f32 1.442695, %v1748_v43 }
 0x4cb   : > { %v1742_v56 = vpop.xlane.xlu1 %1741 }
 0x4cc   : > { %5907 = vpow2.f32 %v1761_v45  ;;  %v1750_v51 = vsub.f32 %v6609_v11, %v1742_v56 }
 0x4ce   : > { %v1765_v59 = vmul.f32 1.442695, %v1750_v51 }
 0x4cf   : > { %v2219_v37 = vpop.xlane.xlu1 %2218 }
 0x4d0   : > { %5909 = vpow2.f32 %v1765_v59  ;;  %v2262_v44 = vmul.f32 0.0625, %v2219_v37  ;;  %v2276_v37 = vld [vmem:[%s7361_s7] sm:$0xff] }
 0x4d1   : > { %5911 = vpow2.f32 %v1763_v62 }
 0x4d3   : > { %v2222_v46 = vpop.xlane.xlu1 %2221 }
 0x4d6   : > { %v6675_v15 = vpop.eup %5907 }
 0x4d7   : > { %v1782_v4 = vsel %vm979_vm1, %v6675_v15, 0.0  ;;  %v6718_v47 = vpop.xlane.xlu1 %2224 }
 0x4d8   : > { %1783 = vadd.xlane.f32.xlu0 %v1782_v4 }
 0x4d9   : > { %1780 = vadd.xlane.f32.xlu1 %v1779_v8 }
 0x4da   : > { %v6681_v26 = vpop.eup %5909 }
 0x4db   : > { %v1788_v11 = vsel %vm979_vm1, %v6681_v26, 0.0  ;;  %v6685_v5 = vpop.eup %5911  ;;  %v6720_v40 = vpop.xlane.xlu1 %2227 }
 0x4dc   : > { %v1785_v38 = vsel %vm979_vm1, %v6685_v5, 0.0 }
 0x4dd   : > { %1789 = vadd.xlane.f32.xlu1 %v1788_v11 }
 0x4e1   : > { %1786 = vadd.xlane.f32.xlu1 %v1785_v38 }
 0x4e5   : > { %2233 = vadd.xlane.f32.xlu1 %v2232_v9 }
 0x4e9   : > { %2236 = vadd.xlane.f32.xlu1 %v2235_v10 }
 0x4ed   : > { %2242 = vadd.xlane.f32.xlu1 %v2241_v52 }
 0x4ee   : > { %5861 = vrot.lane.b32.xlu0 %v5860_v53, %s6189_s30  ;;  %s5082_s30 = sshll.u32 %s6296_s22, 10  ;;  %s7313_s22 = scalar_lea.sflag [#allocation3], %s488_s20 }
 0x4ef   : > { %s7305_s24 = scalar_lea.hbm %s7369_s15, %s5082_s30  ;;  %s6125_s30 = sshll.u32 %s6192_s25, 4  ;;  %s6126_s30 = int_to_ptr.vmem [resolvable:$false] %s6125_s30 }
 0x4f0   : > { %p6128_p0 = scmp.lt.s32.totalorder %s7307_s16, %s6126_s30 }
 0x4f1   : > { %2245 = vadd.xlane.f32.xlu1 %v2244_v54 }
 0x4f5   : > { %2248 = vadd.xlane.f32.xlu1 %v2247_v55 }
 0x4f9   : > { %2251 = vadd.xlane.f32.xlu1 %v2250_v57 }
 0x4fd   : > { %2254 = vadd.xlane.f32.xlu1 %v2253_v13 }
 0x501   : > { %2257 = vadd.xlane.f32.xlu1 %v2256_v14 }
 0x50d   : > { %2239 = vadd.xlane.f32.xlu0 %v2238_v30  ;;  %v2260_v30 = vmul.f32 0.0625, %v6668_v39 }
 0x52c   : > { %v1772_v43 = vpop.xlane.xlu1 %1771 }
 0x52d   : > { %5913 = vrcp.f32 %v1772_v43  ;;  %v1769_v45 = vpop.xlane.xlu0 %1768 }
 0x52e   : > { %5915 = vrcp.f32 %v1769_v45  ;;  %v2261_v45 = vmul.f32 0.0625, %v6623_v27 }
 0x531   : > { %v1778_v50 = vpop.xlane.xlu1 %1777  ;;  %v6722_v56 = vpop.xlane.xlu0 %2230 }
 0x532   : > { %5917 = vrcp.f32 %v1778_v50 }
 0x535   : > { %v1775_v51 = vpop.xlane.xlu0 %1774  ;;  %v5857_v59 = vpop.permute.xlu1 %5856 }
 0x536   : > { %5919 = vrcp.f32 %v1775_v51  ;;  %v5859_v8 = vunpack.i.h.bf16 %v5857_v59  ;;  %v5858_v11 = vunpack.i.l.bf16 %v5857_v59 }
 0x537   : > { %v5914_v62 = vpop.eup %5913 }
 0x538   : > { %v5916_v4 = vpop.eup %5915  ;;  %v1800_v9 = vmul.f32 %v5914_v62, %v6633_v36  ;;  %v5663_v10 = vpack.c.bf16 %v5859_v8, %v5858_v11  ;;  %v5682_v62 = vpack.c.bf16 %v2261_v45, %v2260_v30 }
 0x539   : > { %v1799_v38 = vmul.f32 %v5916_v4, %v6635_v2  ;;  %v2263_v4 = vmul.f32 0.0625, %v2222_v46 }
 0x53b   : > { %5373 = vmatprep.mubr.msk.f32.mxu1 %vm979_vm1, %v1799_v38  ;;  %v5685_v39 = vpack.c.bf16 %v2263_v4, %v2262_v44 }
 0x53c   : > { %5374 = vmatmul.mubr.msk.f32.vlgmr.msra.gmra.mrb[18].mxu1 %vm979_vm1, %v1800_v9  ;;  %v5918_v52 = vpop.eup %5917 }
 0x53d   : > { %5662 = vmatpush3.bf16.xpose.msk.msra.mxu1 %vm6571_vm6, %v6585_v48  ;;  %v1802_v2 = vmul.f32 %v5918_v52, %v6641_v12 }
 0x53e   : > { %5665 = vmatprep.subr.msk.bf16.mxu1 %vm6571_vm6, %v5663_v10 }
 0x540   : > { %v5920_v53 = vpop.eup %5919 }
 0x541   : > { %v1801_v54 = vmul.f32 %v5920_v53, %v6647_v17 }
 0x543   : > { %5384 = vmatprep.mubr.msk.f32.mxu0 %vm979_vm1, %v1801_v54 }
 0x544   : > { %5385 = vmatmul.mubr.msk.f32.vlgmr.msra.gmra.mrb[22].mxu0 %vm979_vm1, %v1802_v2 }
 0x545   : > { %5668 = vmatpush3.bf16.xpose.msk.msra.mxu1 %vm6571_vm6, %v5663_v10  ;;  %5674 = vmatpush3.bf16.xpose.msk.msra.mxu0 %vm6571_vm6, %v6649_v25 }
 0x546   : > { %5681 = vmatprep.subr.bf16.mxu1 %v6185_v42 }
 0x565   : > { %v1784_v48 = vpop.xlane.xlu0 %1783 }
 0x566   : > { %5921 = vrcp.f32 %v1784_v48  ;;  %v1781_v36 = vpop.xlane.xlu1 %1780 }
 0x567   : > { %5923 = vrcp.f32 %v1781_v36 }
 0x569   : > { %v5862_v17 = vpop.permute.xlu0 %5861 }
 0x56a   : > { %v5864_v55 = vunpack.i.h.bf16 %v5862_v17  ;;  %v5863_v12 = vunpack.i.l.bf16 %v5862_v17  ;;  %v1790_v57 = vpop.xlane.xlu1 %1789 }
 0x56b   : > { %5925 = vrcp.f32 %v1790_v57 }
 0x56c   : > { %v5675_v13 = vpack.c.bf16 %v5864_v55, %v5863_v12 }
 0x56e   : > { %5677 = vmatprep.subr.msk.bf16.mxu0 %vm6571_vm6, %v5675_v13  ;;  %v1787_v14 = vpop.xlane.xlu1 %1786 }
 0x56f   : > { %5927 = vrcp.f32 %v1787_v14  ;;  %5680 = vmatpush3.bf16.xpose.msk.msra.mxu0 %vm6571_vm6, %v5675_v13 }
 0x570   : > { %v5922_v25 = vpop.eup %5921  ;;  %5687 = vmatprep.subr.bf16.mxu0 %v6185_v42 }
 0x571   : > { %v5924_v43 = vpop.eup %5923  ;;  %v1804_v59 = vmul.f32 %v5922_v25, %v6675_v15  ;;  %v2264_v15 = vmul.f32 0.0625, %v6718_v47  ;;  %v2266_v47 = vmul.f32 0.0625, %v6722_v56 }
 0x572   : > { %v2234_v50 = vpop.xlane.xlu1 %2233  ;;  %v1803_v51 = vmul.f32 %v5924_v43, %v6673_v21  ;;  %v2265_v21 = vmul.f32 0.0625, %v6720_v40 }
 0x573   : > { %v2267_v52 = vmul.f32 0.0625, %v2234_v50  ;;  %v2564_v50 = vld [vmem:[%s7362_s8] sm:$0xff] }
 0x574   : > { %5395 = vmatprep.mubr.msk.f32.mxu1 %vm979_vm1, %v1803_v51  ;;  %v5688_v10 = vpack.c.bf16 %v2265_v21, %v2264_v15 }
 0x575   : > { %5396 = vmatmul.mubr.msk.f32.vlgmr.msra.gmra.mrb[20].mxu1 %vm979_vm1, %v1804_v59  ;;  %v5926_v27 = vpop.eup %5925 }
 0x576   : > { %5683 = vmatpush3.bf16.msra.mxu1 %v5682_v62  ;;  %v2237_v8 = vpop.xlane.xlu1 %2236  ;;  %5417 = vmatprep.mubr.msk.f32.mxu1 %vm6186_vm3, %v6187_v58  ;;  %v1806_v9 = vmul.f32 %v5926_v27, %v6681_v26  ;;  %v5691_v26 = vpack.c.bf16 %v2267_v52, %v2266_v47 }
 0x577   : > { %5684 = vmatprep.subr.bf16.mxu1 %v6185_v42  ;;  %v2268_v13 = vmul.f32 0.0625, %v2237_v8 }
 0x579   : > { %v5928_v11 = vpop.eup %5927 }
 0x57a   : > { %5686 = vmatpush3.bf16.msra.mxu1 %v5685_v39  ;;  %v2243_v46 = vpop.xlane.xlu1 %2242  ;;  %v1805_v38 = vmul.f32 %v5928_v11, %v6685_v5 }
 0x57b   : > { %5693 = vmatprep.subr.bf16.mxu1 %v6185_v42  ;;  %v2270_v43 = vmul.f32 0.0625, %v2243_v46  ;;  %v2565_v46 = vld [vmem:[%s7362_s8 + $0x8] sm:$0xff] }
 0x57c   : > { %5406 = vmatprep.mubr.msk.f32.mxu0 %vm979_vm1, %v1805_v38  ;;  %v2566_v38 = vld [vmem:[%s7362_s8 + $0x10] sm:$0xff] }
 0x57d   : > { %5418 = vmatmul.mubr.msk.f32.vlgmr.msra.gmra.mrb[22].mxu1 %vm518_vm0, %v2276_v37  ;;  %5407 = vmatmul.mubr.msk.f32.vlgmr.msra.gmra.mrb[24].mxu0 %vm979_vm1, %v1806_v9 }
 0x57e   : > { %5689 = vmatpush3.bf16.msra.mxu0 %v5688_v10  ;;  %v2246_v5 = vpop.xlane.xlu1 %2245  ;;  %5428 = vmatprep.mubr.msk.f32.mxu0 %vm6186_vm3, %v6187_v58 }
 0x57f   : > { %5690 = vmatprep.subr.bf16.mxu0 %v6185_v42  ;;  %5439 = vmatprep.mubr.msk.f32.mxu1 %vm6186_vm3, %v6187_v58  ;;  %v2271_v25 = vmul.f32 0.0625, %v2246_v5 }
 0x581   : > { %v5697_v45 = vpack.c.bf16 %v2271_v25, %v2270_v43 }
 0x582   : > { %5692 = vmatpush3.bf16.msra.mxu0 %v5691_v26  ;;  %v2249_v40 = vpop.xlane.xlu1 %2248 }
 0x583   : > { %5699 = vmatprep.subr.bf16.mxu0 %v6185_v42  ;;  %v2272_v56 = vmul.f32 0.0625, %v2249_v40 }
 0x585   : > { %5429 = vmatmul.mubr.msk.f32.vlgmr.msra.gmra.mrb[26].mxu0 %vm518_vm0, %v2276_v37 }
 0x586   : > { %v2252_v53 = vpop.xlane.xlu1 %2251  ;;  %5450 = vmatprep.mubr.msk.f32.mxu0 %vm6186_vm3, %v6187_v58 }
 0x587   : > { %v2273_v54 = vmul.f32 0.0625, %v2252_v53 }
 0x589   : > { %v5700_v2 = vpack.c.bf16 %v2273_v54, %v2272_v56 }
 0x58a   : > { %v2255_v48 = vpop.xlane.xlu1 %2254 }
 0x58b   : > { %5701 = vmatpush3.bf16.msra.mxu0 %v5700_v2  ;;  %v2274_v17 = vmul.f32 0.0625, %v2255_v48 }
 0x58c   : > { %5702 = vmatprep.subr.bf16.mxu0 %v6185_v42 }
 0x58e   : > { %v2258_v36 = vpop.xlane.xlu1 %2257 }
 0x58f   : > { %v2275_v55 = vmul.f32 0.0625, %v2258_v36 }
 0x591   : > { %v5703_v12 = vpack.c.bf16 %v2275_v55, %v2274_v17 }
 0x593   : > { %5704 = vmatpush3.bf16.msra.mxu0 %v5703_v12 }
 0x596   : > { %5451 = vmatmul.mubr.msk.f32.vlgmr.msra.gmra.mrb[28].mxu0 %vm518_vm0, %v2276_v37 }
 0x597   : > { %5463 = vmatprep.mubr.msk.f32.mxu0 %vm979_vm1, %v2564_v50 }
 0x59a   : > { %v2240_v57 = vpop.xlane.xlu0 %2239 }
 0x59b   : > { %v2269_v14 = vmul.f32 0.0625, %v2240_v57 }
 0x59d   : > { %v5694_v30 = vpack.c.bf16 %v2269_v14, %v2268_v13 }
 0x59f   : > { %5695 = vmatpush3.bf16.msra.mxu1 %v5694_v30 }
 0x5a0   : > { %5696 = vmatprep.subr.bf16.mxu1 %v6185_v42 }
 0x5a3   : > { %5698 = vmatpush3.bf16.msra.mxu1 %v5697_v45 }
 0x5a6   : > { %5440 = vmatmul.mubr.msk.f32.vlgmr.msra.gmra.mrb[24].mxu1 %vm518_vm0, %v2276_v37  ;;  %v2567_v37 = vld [vmem:[%s7362_s8 + $0x18] sm:$0xff] }
 0x5a7   : > { %5455 = vmatprep.mubr.msk.f32.mxu1 %vm979_vm1, %v2564_v50 }
 0x60f   : > { %v6787_v51 = vpop.f32.mrb[18].mxu1 }
 0x610   : > { %v6789_v59 = vpop.f32.mrb[19].mxu1 }
 0x617   : > { %v6791_v62 = vpop.f32.mrb[22].mxu0 }
 0x618   : > { %v6793_v4 = vpop.f32.mrb[23].mxu0 }
 0x648   : > { %v6795_v44 = vpop.f32.mrb[20].mxu1 }
 0x649   : > { %v6797_v8 = vpop.f32.mrb[21].mxu1 }
 0x650   : > { %v2346_v27 = vpop.f32.mrb[22].mxu1  ;;  %v6799_v39 = vpop.f32.mrb[24].mxu0 }
 0x651   : > { %v2560_v21 = vmax.f32 %v2346_v27, 0.0  ;;  %v6801_v11 = vpop.f32.mrb[25].mxu0  ;;  %v5419_v15 = vpop.f32.mrb[23].mxu1 }
 0x653   : > { %5453 = vmatprep.subr.mxu1 %v2560_v21 }
 0x654   : > { %5454 = vmatpush3.msra.mxu1 %v2560_v21 }
 0x655   : > { %5456 = vmatmul.mubr.msk.f32.vlgmr.msra.gmra.mrb[26].mxu1 %vm979_vm1, %v2565_v46 }
 0x656   : > { %5458 = vmatprep.mubr.msk.f32.mxu1 %vm979_vm1, %v2566_v38 }
 0x658   : > { %v2416_v9 = vpop.f32.mrb[26].mxu0 }
 0x659   : > { %v2561_v10 = vmax.f32 %v2416_v9, 0.0  ;;  %5459 = vmatmul.mubr.msk.f32.gmra.mrb[28].mxu1 %vm979_vm1, %v2567_v37  ;;  %v5430_v52 = vpop.f32.mrb[27].mxu0 }
 0x65a   : > { %5471 = vmatprep.mubr.msk.f32.mxu1 %vm979_vm1, %v2564_v50 }
 0x65b   : > { %5461 = vmatprep.subr.mxu0 %v2561_v10 }
 0x65c   : > { %5462 = vmatpush3.msra.mxu0 %v2561_v10 }
 0x65d   : > { %5464 = vmatmul.mubr.msk.f32.vlgmr.msra.gmra.mrb[30].mxu0 %vm979_vm1, %v2565_v46 }
 0x65e   : > { %5466 = vmatprep.mubr.msk.f32.mxu0 %vm979_vm1, %v2566_v38 }
 0x661   : > { %5467 = vmatmul.mubr.msk.f32.gmra.mrb[32].mxu0 %vm979_vm1, %v2567_v37 }
 0x662   : > { %5479 = vmatprep.mubr.msk.f32.mxu0 %vm979_vm1, %v2564_v50 }
 0x669   : > { %v2556_v47 = vpop.f32.mrb[28].mxu0 }
 0x66a   : > { %v2563_v5 = vmax.f32 %v2556_v47, 0.0  ;;  %v5452_v26 = vpop.f32.mrb[29].mxu0 }
 0x66c   : > { %5477 = vmatprep.subr.mxu0 %v2563_v5 }
 0x66d   : > { %5478 = vmatpush3.msra.mxu0 %v2563_v5 }
 0x66e   : > { %5480 = vmatmul.mubr.msk.f32.vlgmr.msra.gmra.mrb[34].mxu0 %vm979_vm1, %v2565_v46 }
 0x66f   : > { %5482 = vmatprep.mubr.msk.f32.mxu0 %vm979_vm1, %v2566_v38 }
 0x672   : > { %5483 = vmatmul.mubr.msk.f32.gmra.mrb[36].mxu0 %vm979_vm1, %v2567_v37 }
 0x679   : > { %v2486_v40 = vpop.f32.mrb[24].mxu1 }
 0x67a   : > { %v2562_v53 = vmax.f32 %v2486_v40, 0.0  ;;  %v5441_v56 = vpop.f32.mrb[25].mxu1 }
 0x67c   : > { %5469 = vmatprep.subr.mxu1 %v2562_v53 }
 0x67d   : > { %5470 = vmatpush3.msra.mxu1 %v2562_v53 }
 0x67e   : > { %5472 = vmatmul.mubr.msk.f32.vlgmr.msra.gmra.mrb[30].mxu1 %vm979_vm1, %v2565_v46 }
 0x67f   : > { %5474 = vmatprep.mubr.msk.f32.mxu1 %vm979_vm1, %v2566_v38 }
 0x682   : > { %5475 = vmatmul.mubr.msk.f32.gmra.mrb[32].mxu1 %vm979_vm1, %v2567_v37 }
 0x728   : > { %v5457_v54 = vpop.f32.mrb[26].mxu1 }
 0x729   : > { %v5002_v2 = vmul.f32 -1.442695, %v5457_v54  ;;  %v2646_v48 = vpop.f32.mrb[27].mxu1 }
 0x72a   : > { %v5001_v36 = vmul.f32 -1.442695, %v2646_v48 }
 0x72b   : > { %5929 = vpow2.f32 %v5002_v2 }
 0x72c   : > { %5931 = vpow2.f32 %v5001_v36  ;;  %v5460_v17 = vpop.f32.mrb[28].mxu1 }
 0x72d   : > { %v5004_v55 = vmul.f32 -1.442695, %v5460_v17  ;;  %v2656_v12 = vpop.f32.mrb[29].mxu1 }
 0x72e   : > { %v5003_v25 = vmul.f32 -1.442695, %v2656_v12 }
 0x72f   : > { %5933 = vpow2.f32 %v5004_v55 }
 0x730   : > { %v5465_v57 = vpop.f32.mrb[30].mxu0 }
 0x731   : > { %v5006_v13 = vmul.f32 -1.442695, %v5465_v57  ;;  %v2731_v14 = vpop.f32.mrb[31].mxu0 }
 0x732   : > { %v5005_v30 = vmul.f32 -1.442695, %v2731_v14 }
 0x733   : > { %5935 = vpow2.f32 %v5006_v13 }
 0x734   : > { %5937 = vpow2.f32 %v5005_v30  ;;  %v5468_v43 = vpop.f32.mrb[32].mxu0 }
 0x735   : > { %v5930_v45 = vpop.eup %5929  ;;  %v5008_v50 = vmul.f32 -1.442695, %v5468_v43  ;;  %5939 = vpow2.f32 %v5003_v25  ;;  %v2741_v27 = vpop.f32.mrb[33].mxu0 }
 0x736   : > { %v5932_v21 = vpop.eup %5931  ;;  %v2969_v15 = vadd.f32 1.0, %v5930_v45  ;;  %v5007_v46 = vmul.f32 -1.442695, %v2741_v27 }
 0x737   : > { %v2968_v38 = vadd.f32 1.0, %v5932_v21  ;;  %5941 = vpow2.f32 %v5008_v50 }
 0x738   : > { %5943 = vrcp.f32 %v2969_v15 }
 0x739   : > { %v5934_v37 = vpop.eup %5933  ;;  %5945 = vrcp.f32 %v2968_v38 }
 0x73a   : > { %v2971_v9 = vadd.f32 1.0, %v5934_v37  ;;  %5947 = vpow2.f32 %v5007_v46 }
 0x73c   : > { %5949 = vrcp.f32 %v2971_v9 }
 0x73d   : > { %v5936_v10 = vpop.eup %5935 }
 0x73e   : > { %v5938_v52 = vpop.eup %5937  ;;  %v2973_v47 = vadd.f32 1.0, %v5936_v10 }
 0x73f   : > { %v5940_v5 = vpop.eup %5939  ;;  %v2972_v26 = vadd.f32 1.0, %v5938_v52 }
 0x740   : > { %5951 = vrcp.f32 %v2973_v47  ;;  %v2970_v2 = vadd.f32 1.0, %v5940_v5 }
 0x741   : > { %v5942_v40 = vpop.eup %5941  ;;  %v5481_v53 = vpop.f32.mrb[34].mxu0  ;;  %5953 = vrcp.f32 %v2972_v26 }
 0x742   : > { %v5944_v56 = vpop.eup %5943  ;;  %v2975_v54 = vadd.f32 1.0, %v5942_v40  ;;  %v2901_v48 = vpop.f32.mrb[35].mxu0  ;;  %v5014_v43 = vmul.f32 -1.442695, %v5481_v53 }
 0x743   : > { %v5946_v36 = vpop.eup %5945  ;;  %3023 = vperm.xlu0 %5823, %v5944_v56   ;;  %v5013_v45 = vmul.f32 -1.442695, %v2901_v48 }
 0x744   : > { %v5948_v17 = vpop.eup %5947  ;;  %5955 = vrcp.f32 %v2975_v54  ;;  %3018 = vperm.xlu1 %5824, %v5946_v36  }
 0x745   : > { %v5484_v55 = vpop.f32.mrb[36].mxu0  ;;  %5957 = vrcp.f32 %v2970_v2  ;;  %v2974_v57 = vadd.f32 1.0, %v5948_v17 }
 0x746   : > { %v5950_v12 = vpop.eup %5949  ;;  %v2911_v13 = vpop.f32.mrb[37].mxu0  ;;  %v5016_v52 = vmul.f32 -1.442695, %v5484_v55 }
 0x747   : > { %3033 = vperm.xlu0 %5823, %v5950_v12   ;;  %5959 = vrcp.f32 %v2974_v57  ;;  %v5015_v5 = vmul.f32 -1.442695, %v2911_v13 }
 0x748   : > { %5961 = vpow2.f32 %v5014_v43 }
 0x749   : > { %5963 = vpow2.f32 %v5013_v45 }
 0x74a   : > { %v5952_v14 = vpop.eup %5951 }
 0x74b   : > { %3043 = vperm.xlu1 %5824, %v5952_v14   ;;  %v5954_v25 = vpop.eup %5953 }
 0x74e   : > { %v5956_v30 = vpop.eup %5955 }
 0x74f   : > { %3038 = vperm.xlu1 %5824, %v5954_v25   ;;  %3053 = vperm.xlu0 %5823, %v5956_v30   ;;  %v5958_v50 = vpop.eup %5957 }
 0x751   : > { %v5473_v27 = vpop.f32.mrb[30].mxu1  ;;  %v5960_v38 = vpop.eup %5959 }
 0x752   : > { %v5010_v21 = vmul.f32 -1.442695, %v5473_v27  ;;  %v2816_v15 = vpop.f32.mrb[31].mxu1  ;;  %v5962_v26 = vpop.eup %5961 }
 0x753   : > { %v5009_v46 = vmul.f32 -1.442695, %v2816_v15  ;;  %3028 = vperm.xlu1 %5824, %v5958_v50   ;;  %v5964_v40 = vpop.eup %5963  ;;  %v2981_v2 = vadd.f32 1.0, %v5962_v26 }
 0x754   : > { %5965 = vpow2.f32 %v5010_v21  ;;  %v2980_v36 = vadd.f32 1.0, %v5964_v40 }
 0x755   : > { %5967 = vpow2.f32 %v5009_v46  ;;  %v5476_v37 = vpop.f32.mrb[32].mxu1 }
 0x756   : > { %v5012_v9 = vmul.f32 -1.442695, %v5476_v37  ;;  %v2826_v10 = vpop.f32.mrb[33].mxu1 }
 0x757   : > { %3048 = vperm.xlu1 %5824, %v5960_v38   ;;  %v5011_v47 = vmul.f32 -1.442695, %v2826_v10 }
 0x758   : > { %5969 = vpow2.f32 %v5012_v9 }
 0x759   : > { %5971 = vpow2.f32 %v5011_v47 }
 0x75a   : > { %5973 = vpow2.f32 %v5016_v52 }
 0x75b   : > { %5975 = vpow2.f32 %v5015_v5 }
 0x75e   : > { %v5966_v53 = vpop.eup %5965 }
 0x75f   : > { %v5968_v56 = vpop.eup %5967  ;;  %v2977_v54 = vadd.f32 1.0, %v5966_v53 }
 0x760   : > { %v2976_v48 = vadd.f32 1.0, %v5968_v56 }
 0x761   : > { %5977 = vrcp.f32 %v2977_v54 }
 0x762   : > { %v5970_v17 = vpop.eup %5969  ;;  %5979 = vrcp.f32 %v2976_v48 }
 0x763   : > { %v5972_v12 = vpop.eup %5971  ;;  %5981 = vrcp.f32 %v2981_v2  ;;  %v2979_v55 = vadd.f32 1.0, %v5970_v17 }
 0x764   : > { %v5974_v57 = vpop.eup %5973  ;;  %5983 = vrcp.f32 %v2980_v36  ;;  %v2978_v13 = vadd.f32 1.0, %v5972_v12 }
 0x765   : > { %v5976_v14 = vpop.eup %5975  ;;  %5985 = vrcp.f32 %v2979_v55  ;;  %v2983_v25 = vadd.f32 1.0, %v5974_v57 }
 0x766   : > { %5987 = vrcp.f32 %v2978_v13  ;;  %v2982_v30 = vadd.f32 1.0, %v5976_v14 }
 0x767   : > { %5989 = vrcp.f32 %v2983_v25 }
 0x768   : > { %5991 = vrcp.f32 %v2982_v30 }
 0x76b   : > { %v5978_v43 = vpop.eup %5977 }
 0x76c   : > { %v5980_v45 = vpop.eup %5979  ;;  %3063 = vperm.xlu0 %5823, %v5978_v43  }
 0x76d   : > { %v5982_v50 = vpop.eup %5981  ;;  %3058 = vperm.xlu1 %5824, %v5980_v45  }
 0x76e   : > { %v5984_v27 = vpop.eup %5983 }
 0x76f   : > { %v5986_v21 = vpop.eup %5985 }
 0x770   : > { %3083 = vperm.xlu0 %5823, %v5982_v50   ;;  %v5988_v15 = vpop.eup %5987 }
 0x771   : > { %3078 = vperm.xlu1 %5824, %v5984_v27   ;;  %v5990_v46 = vpop.eup %5989 }
 0x772   : > { %v5992_v38 = vpop.eup %5991 }
 0x774   : > { %3073 = vperm.xlu0 %5823, %v5986_v21  }
 0x775   : > { %3068 = vperm.xlu1 %5824, %v5988_v15  }
 0x778   : > { %3093 = vperm.xlu0 %5823, %v5990_v46  }
 0x779   : > { %3088 = vperm.xlu1 %5824, %v5992_v38  }
 0x7c2   : > { %v3024_v37 = vpop.permute.xlu0 %3023 }
 0x7c3   : > { %v6827_v9 = vmul.f32 %v3024_v37, %v6484_v60  ;;  %v3019_v10 = vpop.permute.xlu1 %3018 }
 0x7c4   : > { %v6830_v52 = vmul.f32 %v3019_v10, %v6488_v61 }
 0x7c5   : > { %v3115_v47 = vsel %vm785_vm2, %v6827_v9, -inf }
 0x7c6   : > { %3116 = vmax.xlane.f32.xlu0 %v3115_v47  ;;  %v3112_v5 = vsel %vm785_vm2, %v6830_v52, -inf  ;;  %v3034_v26 = vpop.permute.xlu0 %3033 }
 0x7c7   : > { %3113 = vmax.xlane.f32.xlu1 %v3112_v5  ;;  %v6840_v60 = vmul.f32 %v3034_v26, %v6500_v1 }
 0x7c9   : > { %v3121_v36 = vsel %vm785_vm2, %v6840_v60, -inf }
 0x7ca   : > { %v3044_v40 = vpop.permute.xlu1 %3043 }
 0x7cb   : > { %v6837_v53 = vmul.f32 %v3044_v40, %v6492_v63 }
 0x7cd   : > { %v3127_v61 = vsel %vm785_vm2, %v6837_v53, -inf }
 0x7ce   : > { %v3054_v56 = vpop.permute.xlu0 %3053  ;;  %3128 = vmax.xlane.f32.xlu1 %v3127_v61  ;;  %v3039_v54 = vpop.permute.xlu1 %3038 }
 0x7cf   : > { %v6845_v2 = vmul.f32 %v3039_v54, %v6496_v0  ;;  %v6848_v48 = vmul.f32 %v3054_v56, %v6553_v19 }
 0x7d1   : > { %v3124_v63 = vsel %vm785_vm2, %v6845_v2, -inf  ;;  %v3133_v12 = vsel %vm785_vm2, %v6848_v48, -inf }
 0x7d2   : > { %3122 = vmax.xlane.f32.xlu1 %v3121_v36  ;;  %3125 = vmax.xlane.f32.xlu0 %v3124_v63  ;;  %v3029_v1 = vpop.permute.xlu1 %3028 }
 0x7d3   : > { %v6855_v17 = vmul.f32 %v3029_v1, %v6504_v20 }
 0x7d5   : > { %v3118_v0 = vsel %vm785_vm2, %v6855_v17, -inf }
 0x7d6   : > { %3134 = vmax.xlane.f32.xlu1 %v3133_v12  ;;  %3119 = vmax.xlane.f32.xlu0 %v3118_v0  ;;  %v3049_v19 = vpop.permute.xlu1 %3048 }
 0x7d7   : > { %v6862_v55 = vmul.f32 %v3049_v19, %v6557_v23 }
 0x7d9   : > { %v3130_v57 = vsel %vm785_vm2, %v6862_v55, -inf }
 0x7da   : > { %3131 = vmax.xlane.f32.xlu0 %v3130_v57 }
 0x7eb   : > { %v3064_v13 = vpop.permute.xlu0 %3063 }
 0x7ec   : > { %v6867_v20 = vmul.f32 %v3064_v13, %v6514_v41  ;;  %v3059_v14 = vpop.permute.xlu1 %3058 }
 0x7ed   : > { %v6870_v25 = vmul.f32 %v3059_v14, %v6518_v31 }
 0x7ee   : > { %v3139_v30 = vsel %vm785_vm2, %v6867_v20, -inf }
 0x7ef   : > { %v3084_v43 = vpop.permute.xlu0 %3083  ;;  %3140 = vmax.xlane.f32.xlu1 %v3139_v30  ;;  %v3136_v23 = vsel %vm785_vm2, %v6870_v25, -inf }
 0x7f0   : > { %v6877_v45 = vmul.f32 %v3084_v43, %v6594_v49  ;;  %3137 = vmax.xlane.f32.xlu0 %v3136_v23  ;;  %v3079_v50 = vpop.permute.xlu1 %3078 }
 0x7f1   : > { %v6880_v41 = vmul.f32 %v3079_v50, %v6598_v6 }
 0x7f2   : > { %v3151_v31 = vsel %vm785_vm2, %v6877_v45, -inf }
 0x7f3   : > { %v3074_v27 = vpop.permute.xlu0 %3073  ;;  %3152 = vmax.xlane.f32.xlu1 %v3151_v31  ;;  %v3148_v21 = vsel %vm785_vm2, %v6880_v41, -inf }
 0x7f4   : > { %v6887_v15 = vmul.f32 %v3074_v27, %v6658_v32  ;;  %3149 = vmax.xlane.f32.xlu0 %v3148_v21  ;;  %v3069_v46 = vpop.permute.xlu1 %3068 }
 0x7f5   : > { %v6890_v49 = vmul.f32 %v3069_v46, %v6662_v33 }
 0x7f6   : > { %v3145_v6 = vsel %vm785_vm2, %v6887_v15, -inf }
 0x7f7   : > { %v3094_v38 = vpop.permute.xlu0 %3093  ;;  %3146 = vmax.xlane.f32.xlu1 %v3145_v6  ;;  %v3142_v37 = vsel %vm785_vm2, %v6890_v49, -inf }
 0x7f8   : > { %v6897_v10 = vmul.f32 %v3094_v38, %v6693_v3  ;;  %3143 = vmax.xlane.f32.xlu0 %v3142_v37  ;;  %v3089_v47 = vpop.permute.xlu1 %3088 }
 0x7f9   : > { %v6900_v32 = vmul.f32 %v3089_v47, %v6697_v7 }
 0x7fa   : > { %v3157_v33 = vsel %vm785_vm2, %v6897_v10, -inf }
 0x7fb   : > { %3158 = vmax.xlane.f32.xlu1 %v3157_v33  ;;  %v3154_v5 = vsel %vm785_vm2, %v6900_v32, -inf }
 0x7fc   : > { %3155 = vmax.xlane.f32.xlu0 %v3154_v5 }
 0x80c   : > { %3292 = vrot.lane.b32.xlu1 %v6350_v16, %s6190_s17 }
 0x810   : > { %3387 = vrot.lane.b32.xlu1 %v6356_v22, %s6190_s17 }
 0x812   : > { %3290 = vrot.lane.b32.xlu0 %v6352_v18, %s6190_s17 }
 0x853   : > { %v3117_v3 = vpop.xlane.xlu0 %3116 }
 0x854   : > { %v3161_v7 = vsub.f32 %v6827_v9, %v3117_v3  ;;  %v3114_v26 = vpop.xlane.xlu1 %3113 }
 0x855   : > { %v3160_v40 = vsub.f32 %v6830_v52, %v3114_v26 }
 0x856   : > { %v3178_v61 = vmul.f32 1.442695, %v3161_v7 }
 0x857   : > { %v3176_v56 = vmul.f32 1.442695, %v3160_v40 }
 0x858   : > { %5993 = vpow2.f32 %v3178_v61 }
 0x859   : > { %5995 = vpow2.f32 %v3176_v56 }
 0x85b   : > { %v3129_v54 = vpop.xlane.xlu1 %3128 }
 0x85c   : > { %v3165_v36 = vsub.f32 %v6837_v53, %v3129_v54 }
 0x85e   : > { %v3186_v16 = vmul.f32 1.442695, %v3165_v36 }
 0x85f   : > { %v3126_v63 = vpop.xlane.xlu0 %3125  ;;  %v3123_v1 = vpop.xlane.xlu1 %3122 }
 0x860   : > { %5997 = vpow2.f32 %v3186_v16  ;;  %v3164_v22 = vsub.f32 %v6845_v2, %v3126_v63  ;;  %v3163_v18 = vsub.f32 %v6840_v60, %v3123_v1 }
 0x862   : > { %v6917_v12 = vpop.eup %5993  ;;  %v3184_v9 = vmul.f32 1.442695, %v3164_v22  ;;  %v3182_v0 = vmul.f32 1.442695, %v3163_v18 }
 0x863   : > { %v6919_v52 = vpop.eup %5995  ;;  %v3120_v19 = vpop.xlane.xlu0 %3119  ;;  %v3211_v13 = vsel %vm785_vm2, %v6917_v12, 0.0 }
 0x864   : > { %v3135_v57 = vpop.xlane.xlu1 %3134  ;;  %5999 = vpow2.f32 %v3184_v9  ;;  %v3162_v53 = vsub.f32 %v6855_v17, %v3120_v19  ;;  %3212 = vadd.xlane.f32.xlu1 %v3211_v13  ;;  %v3208_v60 = vsel %vm785_vm2, %v6919_v52, 0.0 }
 0x865   : > { %v3167_v14 = vsub.f32 %v6848_v48, %v3135_v57  ;;  %6001 = vpow2.f32 %v3182_v0  ;;  %3209 = vadd.xlane.f32.xlu0 %v3208_v60 }
 0x866   : > { %v3180_v2 = vmul.f32 1.442695, %v3162_v53 }
 0x867   : > { %v3190_v30 = vmul.f32 1.442695, %v3167_v14  ;;  %v3132_v43 = vpop.xlane.xlu0 %3131 }
 0x868   : > { %6003 = vpow2.f32 %v3180_v2  ;;  %v3166_v23 = vsub.f32 %v6862_v55, %v3132_v43 }
 0x869   : > { %6005 = vpow2.f32 %v3190_v30 }
 0x86a   : > { %v6928_v50 = vpop.eup %5997  ;;  %v3188_v31 = vmul.f32 1.442695, %v3166_v23 }
 0x86b   : > { %v3223_v17 = vsel %vm785_vm2, %v6928_v50, 0.0 }
 0x86c   : > { %6007 = vpow2.f32 %v3188_v31  ;;  %3224 = vadd.xlane.f32.xlu1 %v3223_v17 }
 0x86e   : > { %v6932_v48 = vpop.eup %5999 }
 0x86f   : > { %v6934_v27 = vpop.eup %6001  ;;  %v3220_v21 = vsel %vm785_vm2, %v6932_v48, 0.0 }
 0x870   : > { %3221 = vadd.xlane.f32.xlu0 %v3220_v21  ;;  %v3217_v55 = vsel %vm785_vm2, %v6934_v27, 0.0 }
 0x871   : > { %3218 = vadd.xlane.f32.xlu1 %v3217_v55 }
 0x872   : > { %v6940_v46 = vpop.eup %6003 }
 0x873   : > { %v6942_v6 = vpop.eup %6005  ;;  %v3214_v38 = vsel %vm785_vm2, %v6940_v46, 0.0 }
 0x874   : > { %3215 = vadd.xlane.f32.xlu0 %v3214_v38  ;;  %v3229_v37 = vsel %vm785_vm2, %v6942_v6, 0.0 }
 0x875   : > { %3230 = vadd.xlane.f32.xlu1 %v3229_v37 }
 0x876   : > { %v6948_v47 = vpop.eup %6007 }
 0x877   : > { %v3226_v33 = vsel %vm785_vm2, %v6948_v47, 0.0 }
 0x878   : > { %3227 = vadd.xlane.f32.xlu0 %v3226_v33 }
 0x87c   : > { %v3141_v5 = vpop.xlane.xlu1 %3140 }
 0x87d   : > { %v3169_v3 = vsub.f32 %v6867_v20, %v3141_v5  ;;  %v3138_v7 = vpop.xlane.xlu0 %3137 }
 0x87e   : > { %v3168_v26 = vsub.f32 %v6870_v25, %v3138_v7 }
 0x87f   : > { %v3194_v40 = vmul.f32 1.442695, %v3169_v3 }
 0x880   : > { %v3192_v61 = vmul.f32 1.442695, %v3168_v26  ;;  %v3153_v56 = vpop.xlane.xlu1 %3152 }
 0x881   : > { %6009 = vpow2.f32 %v3194_v40  ;;  %v3173_v54 = vsub.f32 %v6877_v45, %v3153_v56  ;;  %v3150_v36 = vpop.xlane.xlu0 %3149 }
 0x882   : > { %6011 = vpow2.f32 %v3192_v61  ;;  %v3172_v16 = vsub.f32 %v6880_v41, %v3150_v36 }
 0x883   : > { %v3202_v63 = vmul.f32 1.442695, %v3173_v54 }
 0x884   : > { %v3200_v1 = vmul.f32 1.442695, %v3172_v16  ;;  %v3147_v22 = vpop.xlane.xlu1 %3146 }
 0x885   : > { %6013 = vpow2.f32 %v3202_v63  ;;  %v3171_v18 = vsub.f32 %v6887_v15, %v3147_v22  ;;  %v3144_v20 = vpop.xlane.xlu0 %3143 }
 0x886   : > { %6015 = vpow2.f32 %v3200_v1  ;;  %v3170_v25 = vsub.f32 %v6890_v49, %v3144_v20 }
 0x887   : > { %v3198_v9 = vmul.f32 1.442695, %v3171_v18 }
 0x888   : > { %v3196_v0 = vmul.f32 1.442695, %v3170_v25  ;;  %v3159_v19 = vpop.xlane.xlu1 %3158 }
 0x889   : > { %6017 = vpow2.f32 %v3198_v9  ;;  %v3175_v45 = vsub.f32 %v6897_v10, %v3159_v19  ;;  %v3156_v57 = vpop.xlane.xlu0 %3155 }
 0x88a   : > { %6019 = vpow2.f32 %v3196_v0  ;;  %v3174_v41 = vsub.f32 %v6900_v32, %v3156_v57 }
 0x88b   : > { %v6960_v13 = vpop.eup %6009  ;;  %v3206_v53 = vmul.f32 1.442695, %v3175_v45 }
 0x88c   : > { %v6962_v14 = vpop.eup %6011  ;;  %v3204_v15 = vmul.f32 1.442695, %v3174_v41  ;;  %v6964_v60 = vpop.permute.xlu1 %3292  ;;  %v3235_v49 = vsel %vm785_vm2, %v6960_v13, 0.0 }
 0x88d   : > { %6021 = vpow2.f32 %v3206_v53  ;;  %v3291_v2 = vpop.permute.xlu0 %3290  ;;  %3236 = vadd.xlane.f32.xlu1 %v3235_v49  ;;  %v3232_v10 = vsel %vm785_vm2, %v6962_v14, 0.0 }
 0x88e   : > { %6023 = vpow2.f32 %v3204_v15  ;;  %5493 = vmatprep.mubr.msk.f32.mxu1 %vm785_vm2, %v3291_v2  ;;  %3233 = vadd.xlane.f32.xlu0 %v3232_v10 }
 0x88f   : > { %v6971_v32 = vpop.eup %6013 }
 0x890   : > { %v6973_v30 = vpop.eup %6015  ;;  %v3388_v43 = vpop.permute.xlu1 %3387  ;;  %v3247_v23 = vsel %vm785_vm2, %v6971_v32, 0.0 }
 0x891   : > { %3248 = vadd.xlane.f32.xlu1 %v3247_v23  ;;  %5504 = vmatprep.mubr.msk.f32.mxu0 %vm785_vm2, %v3388_v43  ;;  %v3244_v31 = vsel %vm785_vm2, %v6973_v30, 0.0 }
 0x892   : > { %3245 = vadd.xlane.f32.xlu0 %v3244_v31 }
 0x893   : > { %v6980_v17 = vpop.eup %6017 }
 0x894   : > { %v6982_v21 = vpop.eup %6019  ;;  %v3241_v55 = vsel %vm785_vm2, %v6980_v17, 0.0 }
 0x895   : > { %3242 = vadd.xlane.f32.xlu1 %v3241_v55  ;;  %v3238_v38 = vsel %vm785_vm2, %v6982_v21, 0.0 }
 0x896   : > { %3239 = vadd.xlane.f32.xlu0 %v3238_v38 }
 0x897   : > { %v6988_v37 = vpop.eup %6021 }
 0x898   : > { %v6990_v33 = vpop.eup %6023  ;;  %v3253_v5 = vsel %vm785_vm2, %v6988_v37, 0.0 }
 0x899   : > { %3254 = vadd.xlane.f32.xlu1 %v3253_v5  ;;  %v3250_v3 = vsel %vm785_vm2, %v6990_v33, 0.0 }
 0x89a   : > { %3251 = vadd.xlane.f32.xlu0 %v3250_v3 }
 0x8aa   : > { %3484 = vrot.lane.b32.xlu1 %v6364_v28, %s6190_s17 }
 0x8ae   : > { %3581 = vrot.lane.b32.xlu1 %v6372_v34, %s6190_s17 }
 0x8b0   : > { %3389 = vrot.lane.b32.xlu0 %v6360_v24, %s6190_s17 }
 0x8b4   : > { %3486 = vrot.lane.b32.xlu0 %v6366_v29, %s6190_s17 }
 0x8b8   : > { %3583 = vrot.lane.b32.xlu0 %v6374_v35, %s6190_s17  ;;  %s6127_s17 = scalar_lea.vmem %s6126_s30, 2048 }
 0x8b9   : > { %p6129_p1 = scmp.lt.s32.totalorder %s6127_s17, %s6121_s27 }
 0x8bb   : > { %p6130_p2 = por %p6129_p1, %p6128_p0 }
 0x8bd   : > { %p6131_p3 = pnand %p6130_p2, %p6124_p13 }
 0x8f1   : > { %v3213_v7 = vpop.xlane.xlu1 %3212 }
 0x8f2   : > { %6025 = vrcp.f32 %v3213_v7  ;;  %v3210_v26 = vpop.xlane.xlu0 %3209 }
 0x8f3   : > { %6027 = vrcp.f32 %v3210_v26 }
 0x8f9   : > { %v3225_v40 = vpop.xlane.xlu1 %3224 }
 0x8fa   : > { %6029 = vrcp.f32 %v3225_v40 }
 0x8fc   : > { %v6026_v61 = vpop.eup %6025 }
 0x8fd   : > { %v6028_v28 = vpop.eup %6027  ;;  %v3222_v56 = vpop.xlane.xlu0 %3221  ;;  %v3273_v34 = vmul.f32 %v6026_v61, %v6917_v12 }
 0x8fe   : > { %6031 = vrcp.f32 %v3222_v56  ;;  %v3219_v54 = vpop.xlane.xlu1 %3218  ;;  %v3272_v24 = vmul.f32 %v6028_v28, %v6919_v52 }
 0x8ff   : > { %6033 = vrcp.f32 %v3219_v54 }
 0x900   : > { %v5705_v35 = vpack.c.bf16 %v3273_v34, %v3272_v24 }
 0x901   : > { %v3216_v36 = vpop.xlane.xlu0 %3215 }
 0x902   : > { %6035 = vrcp.f32 %v3216_v36  ;;  %v3231_v16 = vpop.xlane.xlu1 %3230  ;;  %5707 = vmatprep.subr.msk.bf16.mxu1 %vm7010_vm7, %v5705_v35 }
 0x903   : > { %5710 = vmatpush3.bf16.xpose.msk.msra.mxu1 %vm7010_vm7, %v5705_v35  ;;  %6037 = vrcp.f32 %v3231_v16 }
 0x904   : > { %v6030_v52 = vpop.eup %6029 }
 0x905   : > { %v3228_v12 = vpop.xlane.xlu0 %3227  ;;  %v3277_v22 = vmul.f32 %v6030_v52, %v6928_v50 }
 0x906   : > { %6039 = vrcp.f32 %v3228_v12 }
 0x908   : > { %v6032_v63 = vpop.eup %6031 }
 0x909   : > { %v3276_v1 = vmul.f32 %v6032_v63, %v6932_v48  ;;  %v6034_v18 = vpop.eup %6033 }
 0x90a   : > { %v3275_v0 = vmul.f32 %v6034_v18, %v6934_v27 }
 0x90b   : > { %v5717_v20 = vpack.c.bf16 %v3277_v22, %v3276_v1 }
 0x90c   : > { %v6036_v25 = vpop.eup %6035 }
 0x90d   : > { %5719 = vmatprep.subr.msk.bf16.mxu0 %vm7010_vm7, %v5717_v20  ;;  %v3274_v9 = vmul.f32 %v6036_v25, %v6940_v46  ;;  %v6038_v19 = vpop.eup %6037 }
 0x90e   : > { %5722 = vmatpush3.bf16.xpose.msk.msra.mxu0 %vm7010_vm7, %v5717_v20  ;;  %v3279_v48 = vmul.f32 %v6038_v19, %v6942_v6 }
 0x90f   : > { %v5711_v45 = vpack.c.bf16 %v3275_v0, %v3274_v9 }
 0x910   : > { %v6040_v57 = vpop.eup %6039 }
 0x911   : > { %5713 = vmatprep.subr.msk.bf16.mxu1 %vm7010_vm7, %v5711_v45  ;;  %v3278_v50 = vmul.f32 %v6040_v57, %v6948_v47 }
 0x912   : > { %5716 = vmatpush3.bf16.xpose.msk.msra.mxu1 %vm7010_vm7, %v5711_v45 }
 0x913   : > { %v5723_v41 = vpack.c.bf16 %v3279_v48, %v3278_v50 }
 0x915   : > { %5725 = vmatprep.subr.msk.bf16.mxu0 %vm7010_vm7, %v5723_v41 }
 0x916   : > { %5728 = vmatpush3.bf16.xpose.msk.msra.mxu0 %vm7010_vm7, %v5723_v41 }
 0x919   : > { %5494 = vmatmul.mubr.msk.f32.vlgmr.msra.gmra.mrb[34].mxu1 %vm785_vm2, %v6964_v60 }
 0x91a   : > { %v3237_v27 = vpop.xlane.xlu1 %3236 }
 0x91b   : > { %6041 = vrcp.f32 %v3237_v27  ;;  %v3234_v46 = vpop.xlane.xlu0 %3233 }
 0x91c   : > { %6043 = vrcp.f32 %v3234_v46 }
 0x91e   : > { %v3249_v47 = vpop.xlane.xlu1 %3248 }
 0x91f   : > { %6045 = vrcp.f32 %v3249_v47  ;;  %v3246_v6 = vpop.xlane.xlu0 %3245 }
 0x920   : > { %6047 = vrcp.f32 %v3246_v6 }
 0x922   : > { %v3243_v53 = vpop.xlane.xlu1 %3242 }
 0x923   : > { %6049 = vrcp.f32 %v3243_v53  ;;  %v3240_v15 = vpop.xlane.xlu0 %3239 }
 0x924   : > { %6051 = vrcp.f32 %v3240_v15 }
 0x925   : > { %v6042_v49 = vpop.eup %6041 }
 0x926   : > { %v6044_v2 = vpop.eup %6043  ;;  %v3255_v10 = vpop.xlane.xlu1 %3254  ;;  %v3281_v43 = vmul.f32 %v6042_v49, %v6960_v13 }
 0x927   : > { %6053 = vrcp.f32 %v3255_v10  ;;  %v3252_v23 = vpop.xlane.xlu0 %3251  ;;  %v3280_v60 = vmul.f32 %v6044_v2, %v6962_v14  ;;  %v3717_v10 = vld [vmem:[%s7363_s9] sm:$0xf] }
 0x928   : > { %6055 = vrcp.f32 %v3252_v23 }
 0x929   : > { %v6046_v31 = vpop.eup %6045  ;;  %v5729_v55 = vpack.c.bf16 %v3281_v43, %v3280_v60 }
 0x92a   : > { %v6048_v38 = vpop.eup %6047  ;;  %v3485_v5 = vpop.permute.xlu1 %3484  ;;  %v3285_v3 = vmul.f32 %v6046_v31, %v6971_v32 }
 0x92b   : > { %v3390_v7 = vpop.permute.xlu0 %3389  ;;  %5731 = vmatprep.subr.msk.bf16.mxu1 %vm7010_vm7, %v5729_v55  ;;  %5515 = vmatprep.mubr.msk.f32.mxu1 %vm785_vm2, %v3485_v5  ;;  %v3284_v26 = vmul.f32 %v6048_v38, %v6973_v30 }
 0x92c   : > { %5505 = vmatmul.mubr.msk.f32.vlgmr.msra.gmra.mrb[38].mxu0 %vm785_vm2, %v3390_v7  ;;  %5734 = vmatpush3.bf16.xpose.msk.msra.mxu1 %vm7010_vm7, %v5729_v55 }
 0x92d   : > { %v6050_v13 = vpop.eup %6049  ;;  %v5741_v14 = vpack.c.bf16 %v3285_v3, %v3284_v26 }
 0x92e   : > { %v6052_v40 = vpop.eup %6051  ;;  %v3582_v61 = vpop.permute.xlu1 %3581  ;;  %v3283_v28 = vmul.f32 %v6050_v13, %v6980_v17 }
 0x92f   : > { %5743 = vmatprep.subr.msk.bf16.mxu0 %vm7010_vm7, %v5741_v14  ;;  %5526 = vmatprep.mubr.msk.f32.mxu0 %vm785_vm2, %v3582_v61  ;;  %v3282_v32 = vmul.f32 %v6052_v40, %v6982_v21  ;;  %v3487_v21 = vpop.permute.xlu0 %3486 }
 0x930   : > { %5746 = vmatpush3.bf16.xpose.msk.msra.mxu0 %vm7010_vm7, %v5741_v14 }
 0x931   : > { %v6054_v30 = vpop.eup %6053  ;;  %v5735_v56 = vpack.c.bf16 %v3283_v28, %v3282_v32 }
 0x932   : > { %v6056_v34 = vpop.eup %6055  ;;  %v3287_v54 = vmul.f32 %v6054_v30, %v6988_v37 }
 0x933   : > { %5737 = vmatprep.subr.msk.bf16.mxu1 %vm7010_vm7, %v5735_v56  ;;  %v3286_v17 = vmul.f32 %v6056_v34, %v6990_v33  ;;  %v3584_v37 = vpop.permute.xlu0 %3583 }
 0x934   : > { %5740 = vmatpush3.bf16.xpose.msk.msra.mxu1 %vm7010_vm7, %v5735_v56 }
 0x935   : > { %v5747_v24 = vpack.c.bf16 %v3287_v54, %v3286_v17  ;;  %5753 = vmatprep.subr.bf16.mxu1 %v6185_v42 }
 0x937   : > { %5749 = vmatprep.subr.msk.bf16.mxu0 %vm7010_vm7, %v5747_v24 }
 0x938   : > { %5752 = vmatpush3.bf16.xpose.msk.msra.mxu0 %vm7010_vm7, %v5747_v24 }
 0x939   : > { %5756 = vmatprep.subr.bf16.mxu0 %v6185_v42 }
 0x93b   : > { %5516 = vmatmul.mubr.msk.f32.vlgmr.msra.gmra.mrb[36].mxu1 %vm785_vm2, %v3487_v21 }
 0x93c   : > { %5533 = vmatprep.mubr.msk.f32.mxu1 %vm6186_vm3, %v6187_v58 }
 0x93f   : > { %5527 = vmatmul.mubr.msk.f32.vlgmr.msra.gmra.mrb[40].mxu0 %vm785_vm2, %v3584_v37 }
 0x940   : > { %5540 = vmatprep.mubr.msk.f32.mxu0 %vm6186_vm3, %v6187_v58 }
 0x9ec   : > { %v7073_v33 = vpop.f32.mrb[34].mxu1 }
 0x9ed   : > { %v3677_v35 = vadd.f32 %v7073_v33, %v6787_v51  ;;  %v7077_v29 = vpop.f32.mrb[35].mxu1 }
 0x9ee   : > { %v3676_v36 = vadd.f32 %v7077_v29, %v6789_v59 }
 0x9ef   : > { %v3687_v16 = vsel %vm518_vm0, %v3677_v35, 0.0 }
 0x9f0   : > { %3688 = vadd.xlane.f32.xlu0 %v3687_v16  ;;  %v3684_v12 = vsel %vm518_vm0, %v3676_v36, 0.0 }
 0x9f1   : > { %3685 = vadd.xlane.f32.xlu1 %v3684_v12 }
 0x9ff   : > { %v7083_v52 = vpop.f32.mrb[38].mxu0 }
 0xa00   : > { %v3679_v63 = vadd.f32 %v7083_v52, %v6791_v62  ;;  %v7087_v1 = vpop.f32.mrb[39].mxu0 }
 0xa01   : > { %v3678_v22 = vadd.f32 %v7087_v1, %v6793_v4 }
 0xa02   : > { %v3693_v18 = vsel %vm518_vm0, %v3679_v63, 0.0 }
 0xa03   : > { %3694 = vadd.xlane.f32.xlu1 %v3693_v18  ;;  %v3690_v20 = vsel %vm518_vm0, %v3678_v22, 0.0 }
 0xa04   : > { %3691 = vadd.xlane.f32.xlu0 %v3690_v20 }
 0xa0e   : > { %v7093_v25 = vpop.f32.mrb[36].mxu1 }
 0xa0f   : > { %v3681_v9 = vadd.f32 %v7093_v25, %v6795_v44  ;;  %v7097_v0 = vpop.f32.mrb[37].mxu1 }
 0xa10   : > { %v3680_v19 = vadd.f32 %v7097_v0, %v6797_v8 }
 0xa11   : > { %v3699_v45 = vsel %vm518_vm0, %v3681_v9, 0.0 }
 0xa12   : > { %3700 = vadd.xlane.f32.xlu1 %v3699_v45  ;;  %v7102_v57 = vpop.f32.mrb[40].mxu0  ;;  %v3696_v50 = vsel %vm518_vm0, %v3680_v19, 0.0 }
 0xa13   : > { %v3683_v48 = vadd.f32 %v7102_v57, %v6799_v39  ;;  %3697 = vadd.xlane.f32.xlu0 %v3696_v50  ;;  %v7107_v41 = vpop.f32.mrb[41].mxu0 }
 0xa14   : > { %v3682_v27 = vadd.f32 %v7107_v41, %v6801_v11 }
 0xa15   : > { %v3705_v46 = vsel %vm518_vm0, %v3683_v48, 0.0 }
 0xa16   : > { %3706 = vadd.xlane.f32.xlu1 %v3705_v46  ;;  %v3702_v47 = vsel %vm518_vm0, %v3682_v27, 0.0 }
 0xa17   : > { %3703 = vadd.xlane.f32.xlu0 %v3702_v47 }
 0xa7d   : > { %v3689_v6 = vpop.xlane.xlu0 %3688 }
 0xa7e   : > { %v3710_v53 = vmul.f32 0.03125, %v3689_v6  ;;  %v3686_v15 = vpop.xlane.xlu1 %3685 }
 0xa7f   : > { %v3709_v49 = vmul.f32 0.03125, %v3686_v15 }
 0xa81   : > { %v5754_v2 = vpack.c.bf16 %v3710_v53, %v3709_v49 }
 0xa83   : > { %5755 = vmatpush3.bf16.msra.mxu1 %v5754_v2 }
 0xa84   : > { %5759 = vmatprep.subr.bf16.mxu1 %v6185_v42 }
 0xa86   : > { %5534 = vmatmul.mubr.msk.f32.vlgmr.msra.gmra.mrb[38].mxu1 %vm785_vm2, %v3717_v10 }
 0xa87   : > { %5547 = vmatprep.mubr.msk.f32.mxu1 %vm6186_vm3, %v6187_v58 }
 0xa90   : > { %v3695_v43 = vpop.xlane.xlu1 %3694 }
 0xa91   : > { %v3712_v23 = vmul.f32 0.03125, %v3695_v43  ;;  %v3692_v60 = vpop.xlane.xlu0 %3691 }
 0xa92   : > { %v3711_v31 = vmul.f32 0.03125, %v3692_v60 }
 0xa94   : > { %v5757_v55 = vpack.c.bf16 %v3712_v23, %v3711_v31 }
 0xa96   : > { %5758 = vmatpush3.bf16.msra.mxu0 %v5757_v55 }
 0xa97   : > { %5762 = vmatprep.subr.bf16.mxu0 %v6185_v42  ;;  %v7129_v42 = vld [vmem:[%s7365_s11] sm:$0xff] }
 0xa99   : > { %5541 = vmatmul.mubr.msk.f32.vlgmr.msra.gmra.mrb[42].mxu0 %vm785_vm2, %v3717_v10 }
 0xa9a   : > { %5554 = vmatprep.mubr.msk.f32.mxu0 %vm6186_vm3, %v6187_v58  ;;  %v3718_v58 = vld [vmem:[%s7364_s10] sm:$0xf] }
 0xa9f   : > { %v3701_v38 = vpop.xlane.xlu1 %3700 }
 0xaa0   : > { %v3714_v5 = vmul.f32 0.03125, %v3701_v38  ;;  %v3698_v3 = vpop.xlane.xlu0 %3697 }
 0xaa1   : > { %v3713_v7 = vmul.f32 0.03125, %v3698_v3 }
 0xaa3   : > { %v5760_v26 = vpack.c.bf16 %v3714_v5, %v3713_v7  ;;  %v3707_v13 = vpop.xlane.xlu1 %3706 }
 0xaa4   : > { %v3716_v14 = vmul.f32 0.03125, %v3707_v13  ;;  %v3704_v40 = vpop.xlane.xlu0 %3703 }
 0xaa5   : > { %v3715_v61 = vmul.f32 0.03125, %v3704_v40  ;;  %5761 = vmatpush3.bf16.msra.mxu1 %v5760_v26 }
 0xaa7   : > { %v5763_v28 = vpack.c.bf16 %v3716_v14, %v3715_v61  ;;  %v6191_v61 = vmov -1.0  }
 0xaa8   : > { %5548 = vmatmul.mubr.msk.f32.vlgmr.msra.gmra.mrb[40].mxu1 %vm785_vm2, %v3717_v10 }
 0xaa9   : > { %5764 = vmatpush3.bf16.msra.mxu0 %v5763_v28  ;;  %5559 = vmatprep.mubr.msk.f32.mxu1 %vm1303_vm4, %v7129_v42 }
 0xaac   : > { %5555 = vmatmul.mubr.msk.f32.vlgmr.msra.gmra.mrb[44].mxu0 %vm785_vm2, %v3717_v10 }
 0xaad   : > { %5567 = vmatprep.mubr.msk.f32.mxu0 %vm1303_vm4, %v7129_v42 }
 0xb59   : > { %v3788_v32 = vpop.f32.mrb[38].mxu1 }
 0xb5a   : > { %v3789_v30 = vadd.f32 %v3788_v32, %v3718_v58  ;;  %v5535_v56 = vpop.f32.mrb[39].mxu1 }
 0xb5c   : > { %v4006_v34 = vmul.f32 0.70710677, %v3789_v30 }
 0xb5e   : > { %v4018_v54 = vand.u32 2147483647, %v4006_v34  ;;  %vm4010_vm8 = vcmp.ge.f32.partialorder %v4006_v34, 0.0  ;;  %v4002_v34 = vmul.f32 0.5, %v3789_v30 }
 0xb5f   : > { %v4014_v28 = vsel %vm4010_vm8, 1.0, %v6191_v61 }
 0xb60   : > { %v4022_v17 = vmul.f32 0.3275911, %v4018_v54  ;;  %v4074_v21 = vsub.f32 0.0, %v4018_v54 }
 0xb62   : > { %v4026_v24 = vadd.f32 1.0, %v4022_v17  ;;  %v4078_v37 = vmul.f32 %v4074_v21, %v4018_v54 }
 0xb64   : > { %6057 = vrcp.f32 %v4026_v24  ;;  %v4082_v18 = vmul.f32 1.442695, %v4078_v37 }
 0xb66   : > { %6059 = vpow2.f32 %v4082_v18  ;;  %v7160_v18 = vld [vmem:[%s7365_s11 + $0x8] sm:$0xff] }
 0xb6c   : > { %v3858_v35 = vpop.f32.mrb[42].mxu0 }
 0xb6d   : > { %v7138_v36 = vadd.f32 %v3858_v35, %v3718_v58  ;;  %v5542_v16 = vpop.f32.mrb[43].mxu0 }
 0xb6e   : > { %v6058_v12 = vpop.eup %6057 }
 0xb6f   : > { %v4038_v63 = vmul.f32 1.0614054, %v6058_v12  ;;  %v7141_v22 = vmul.f32 0.70710677, %v7138_v36 }
 0xb70   : > { %v6060_v10 = vpop.eup %6059 }
 0xb71   : > { %v4042_v20 = vadd.f32 -1.4531521, %v4038_v63  ;;  %v4019_v9 = vand.u32 2147483647, %v7141_v22  ;;  %vm4011_vm9 = vcmp.ge.f32.partialorder %v7141_v22, 0.0 }
 0xb73   : > { %v4046_v19 = vmul.f32 %v6058_v12, %v4042_v20  ;;  %v4023_v45 = vmul.f32 0.3275911, %v4019_v9  ;;  %v4075_v2 = vsub.f32 0.0, %v4019_v9  ;;  %v7166_v20 = vld [vmem:[%s7365_s11 + $0x10] sm:$0xff] }
 0xb75   : > { %v4050_v50 = vadd.f32 1.4214138, %v4046_v19  ;;  %v4027_v48 = vadd.f32 1.0, %v4023_v45  ;;  %v4079_v7 = vmul.f32 %v4075_v2, %v4019_v9  ;;  %v7176_v45 = vld [vmem:[%s7365_s11 + $0x18] sm:$0xff] }
 0xb77   : > { %v4054_v27 = vmul.f32 %v6058_v12, %v4050_v50  ;;  %6061 = vrcp.f32 %v4027_v48  ;;  %v4084_v17 = vmul.f32 1.442695, %v4079_v7  ;;  %v4015_v7 = vsel %vm4011_vm9, 1.0, %v6191_v61 }
 0xb79   : > { %v4058_v46 = vadd.f32 -0.28449672, %v4054_v27 }
 0xb7b   : > { %v4062_v47 = vmul.f32 %v6058_v12, %v4058_v46  ;;  %v3928_v6 = vpop.f32.mrb[40].mxu1 }
 0xb7c   : > { %v7144_v53 = vadd.f32 %v3928_v6, %v3718_v58  ;;  %v5549_v15 = vpop.f32.mrb[41].mxu1 }
 0xb7d   : > { %v4066_v49 = vadd.f32 0.2548296, %v4062_v47 }
 0xb7e   : > { %v7147_v43 = vmul.f32 0.70710677, %v7144_v53 }
 0xb7f   : > { %v4070_v23 = vmul.f32 %v6058_v12, %v4066_v49  ;;  %v3998_v60 = vpop.f32.mrb[44].mxu0 }
 0xb80   : > { %v4020_v31 = vand.u32 2147483647, %v7147_v43  ;;  %v7150_v55 = vadd.f32 %v3998_v60, %v3718_v58  ;;  %v5556_v38 = vpop.f32.mrb[45].mxu0  ;;  %vm4012_vm10 = vcmp.ge.f32.partialorder %v7147_v43, 0.0 }
 0xb81   : > { %v6062_v5 = vpop.eup %6061  ;;  %v4090_v3 = vmul.f32 %v6060_v10, %v4070_v23 }
 0xb82   : > { %v4039_v26 = vmul.f32 1.0614054, %v6062_v5  ;;  %v4024_v13 = vmul.f32 0.3275911, %v4020_v31  ;;  %v7153_v40 = vmul.f32 0.70710677, %v7150_v55 }
 0xb83   : > { %v4094_v14 = vsub.f32 1.0, %v4090_v3  ;;  %v4076_v9 = vsub.f32 0.0, %v4020_v31 }
 0xb84   : > { %v4043_v32 = vadd.f32 -1.4531521, %v4039_v26  ;;  %v4028_v56 = vadd.f32 1.0, %v4024_v13  ;;  %v4021_v58 = vand.u32 2147483647, %v7153_v40  ;;  %vm4013_vm11 = vcmp.ge.f32.partialorder %v7153_v40, 0.0 }
 0xb85   : > { %v4098_v54 = vmul.f32 %v4094_v14, %v4014_v28  ;;  %v4080_v27 = vmul.f32 %v4076_v9, %v4020_v31  ;;  %v4016_v9 = vsel %vm4012_vm10, 1.0, %v6191_v61 }
 0xb86   : > { %v4047_v24 = vmul.f32 %v6062_v5, %v4043_v32  ;;  %6063 = vrcp.f32 %v4028_v56  ;;  %v4025_v37 = vmul.f32 0.3275911, %v4021_v58  ;;  %v4077_v47 = vsub.f32 0.0, %v4021_v58 }
 0xb87   : > { %v4102_v21 = vadd.f32 1.0, %v4098_v54  ;;  %6065 = vpow2.f32 %v4084_v17  ;;  %v4086_v10 = vmul.f32 1.442695, %v4080_v27  ;;  %v4003_v32 = vmul.f32 0.5, %v7138_v36 }
 0xb88   : > { %v4051_v35 = vadd.f32 1.4214138, %v4047_v24  ;;  %v4029_v12 = vadd.f32 1.0, %v4025_v37  ;;  %v4081_v38 = vmul.f32 %v4077_v47, %v4021_v58 }
 0xb89   : > { %v4106_v16 = vmul.f32 %v4102_v21, %v4002_v34 }
 0xb8a   : > { %v4055_v63 = vmul.f32 %v6062_v5, %v4051_v35  ;;  %6067 = vrcp.f32 %v4029_v12  ;;  %v4088_v28 = vmul.f32 1.442695, %v4081_v38 }
 0xb8b   : > { %5557 = vmatprep.subr.msk.mxu1 %vm1310_vm5, %v4106_v16  ;;  %6069 = vpow2.f32 %v4086_v10  ;;  %v7225_v10 = vld [vmem:[%s7366_s12] sm:$0xff] }
 0xb8c   : > { %v4059_v30 = vadd.f32 -0.28449672, %v4055_v63  ;;  %5558 = vmatpush3.msk.msra.mxu1 %vm1310_vm5, %v4106_v16  ;;  %6071 = vpow2.f32 %v4088_v28 }
 0xb8d   : > { %5560 = vmatmul.mubr.msk.f32.vlgmr.msra.gmra.mrb[42].mxu1 %vm1303_vm4, %v7160_v18 }
 0xb8e   : > { %v4063_v19 = vmul.f32 %v6062_v5, %v4059_v30  ;;  %5562 = vmatprep.mubr.msk.f32.mxu1 %vm1303_vm4, %v7166_v20 }
 0xb90   : > { %v6064_v50 = vpop.eup %6063  ;;  %v4067_v48 = vadd.f32 0.2548296, %v4063_v19 }
 0xb91   : > { %v4040_v46 = vmul.f32 1.0614054, %v6064_v50  ;;  %5563 = vmatmul.mubr.msk.f32.gmra.mrb[44].mxu1 %vm1303_vm4, %v7176_v45  ;;  %v6066_v15 = vpop.eup %6065 }
 0xb92   : > { %v4071_v6 = vmul.f32 %v6062_v5, %v4067_v48  ;;  %5575 = vmatprep.mubr.msk.f32.mxu1 %vm1303_vm4, %v7129_v42 }
 0xb93   : > { %v4044_v49 = vadd.f32 -1.4531521, %v4040_v46  ;;  %v4004_v46 = vmul.f32 0.5, %v7144_v53  ;;  %v7220_v53 = vld [vmem:[%s7366_s12 + $0x8] sm:$0xff] }
 0xb94   : > { %v4091_v2 = vmul.f32 %v6066_v15, %v4071_v6  ;;  %v6068_v23 = vpop.eup %6067  ;;  %v4017_v15 = vsel %vm4013_vm11, 1.0, %v6191_v61 }
 0xb95   : > { %v4048_v60 = vmul.f32 %v6064_v50, %v4044_v49  ;;  %v4041_v31 = vmul.f32 1.0614054, %v6068_v23  ;;  %v6070_v36 = vpop.eup %6069 }
 0xb96   : > { %v4095_v3 = vsub.f32 1.0, %v4091_v2 }
 0xb97   : > { %v4052_v26 = vadd.f32 1.4214138, %v4048_v60  ;;  %v4045_v5 = vadd.f32 -1.4531521, %v4041_v31 }
 0xb98   : > { %v4099_v13 = vmul.f32 %v4095_v3, %v4015_v7 }
 0xb99   : > { %v4056_v14 = vmul.f32 %v6064_v50, %v4052_v26  ;;  %v4049_v54 = vmul.f32 %v6068_v23, %v4045_v5 }
 0xb9a   : > { %v4103_v56 = vadd.f32 1.0, %v4099_v13 }
 0xb9b   : > { %v4060_v22 = vadd.f32 -0.28449672, %v4056_v14  ;;  %v4053_v24 = vadd.f32 1.4214138, %v4049_v54 }
 0xb9c   : > { %v4107_v17 = vmul.f32 %v4103_v56, %v4003_v32 }
 0xb9d   : > { %v4064_v34 = vmul.f32 %v6064_v50, %v4060_v22  ;;  %v4057_v58 = vmul.f32 %v6068_v23, %v4053_v24 }
 0xb9e   : > { %5565 = vmatprep.subr.msk.mxu0 %vm1310_vm5, %v4107_v17 }
 0xb9f   : > { %v4068_v21 = vadd.f32 0.2548296, %v4064_v34  ;;  %5566 = vmatpush3.msk.msra.mxu0 %vm1310_vm5, %v4107_v17  ;;  %v4061_v37 = vadd.f32 -0.28449672, %v4057_v58 }
 0xba0   : > { %5568 = vmatmul.mubr.msk.f32.vlgmr.msra.gmra.mrb[46].mxu0 %vm1303_vm4, %v7160_v18 }
 0xba1   : > { %v4072_v35 = vmul.f32 %v6064_v50, %v4068_v21  ;;  %5570 = vmatprep.mubr.msk.f32.mxu0 %vm1303_vm4, %v7166_v20  ;;  %v4065_v16 = vmul.f32 %v6068_v23, %v4061_v37  ;;  %v6072_v50 = vpop.eup %6071 }
 0xba3   : > { %v4092_v12 = vmul.f32 %v6070_v36, %v4072_v35  ;;  %v4069_v63 = vadd.f32 0.2548296, %v4065_v16 }
 0xba4   : > { %5571 = vmatmul.mubr.msk.f32.gmra.mrb[48].mxu0 %vm1303_vm4, %v7176_v45 }
 0xba5   : > { %v4096_v30 = vsub.f32 1.0, %v4092_v12  ;;  %5583 = vmatprep.mubr.msk.f32.mxu0 %vm1303_vm4, %v7129_v42  ;;  %v4073_v19 = vmul.f32 %v6068_v23, %v4069_v63  ;;  %v4005_v42 = vmul.f32 0.5, %v7150_v55 }
 0xba7   : > { %v4100_v48 = vmul.f32 %v4096_v30, %v4016_v9  ;;  %v4093_v27 = vmul.f32 %v6072_v50, %v4073_v19 }
 0xba9   : > { %v4104_v43 = vadd.f32 1.0, %v4100_v48  ;;  %v4097_v47 = vsub.f32 1.0, %v4093_v27 }
 0xbab   : > { %v4108_v6 = vmul.f32 %v4104_v43, %v4004_v46  ;;  %v4101_v49 = vmul.f32 %v4097_v47, %v4017_v15 }
 0xbad   : > { %5573 = vmatprep.subr.msk.mxu1 %vm1310_vm5, %v4108_v6  ;;  %v4105_v2 = vadd.f32 1.0, %v4101_v49 }
 0xbae   : > { %5574 = vmatpush3.msk.msra.mxu1 %vm1310_vm5, %v4108_v6 }
 0xbaf   : > { %5576 = vmatmul.mubr.msk.f32.vlgmr.msra.gmra.mrb[46].mxu1 %vm1303_vm4, %v7160_v18  ;;  %v4109_v40 = vmul.f32 %v4105_v2, %v4005_v42 }
 0xbb0   : > { %5578 = vmatprep.mubr.msk.f32.mxu1 %vm1303_vm4, %v7166_v20 }
 0xbb1   : > { %5581 = vmatprep.subr.msk.mxu0 %vm1310_vm5, %v4109_v40 }
 0xbb2   : > { %5582 = vmatpush3.msk.msra.mxu0 %vm1310_vm5, %v4109_v40 }
 0xbb3   : > { %5579 = vmatmul.mubr.msk.f32.gmra.mrb[48].mxu1 %vm1303_vm4, %v7176_v45  ;;  %5584 = vmatmul.mubr.msk.f32.vlgmr.msra.gmra.mrb[50].mxu0 %vm1303_vm4, %v7160_v18  ;;  %v7230_v18 = vld [vmem:[%s7366_s12 + $0x18] sm:$0xff] }
 0xbb4   : > { %5586 = vmatprep.mubr.msk.f32.mxu0 %vm1303_vm4, %v7166_v20 }
 0xbb7   : > { %5587 = vmatmul.mubr.msk.f32.gmra.mrb[52].mxu0 %vm1303_vm4, %v7176_v45  ;;  %v7236_v45 = vld [vmem:[%s7366_s12 + $0x10] sm:$0xff] }
 0xc60   : > { %v5561_v55 = vpop.f32.mrb[42].mxu1 }
 0xc61   : > { %v4199_v61 = vpop.f32.mrb[43].mxu1  ;;  %v4205_v20 = vadd.f32 %v5561_v55, %v7220_v53 }
 0xc62   : > { %v4200_v23 = vadd.f32 %v4199_v61, %v7225_v10 }
 0xc64   : > { %v5564_v60 = vpop.f32.mrb[44].mxu1 }
 0xc65   : > { %v4215_v38 = vadd.f32 %v5564_v60, %v7230_v18  ;;  %v4209_v3 = vpop.f32.mrb[45].mxu1 }
 0xc66   : > { %v4210_v31 = vadd.f32 %v4209_v3, %v7236_v45 }
 0xc67   : > { %v4483_v7 = vmax.f32 %v4205_v20, %v4215_v38 }
 0xc68   : > { %v4482_v26 = vmax.f32 %v4200_v23, %v4210_v31 }
 0xc69   : > { %v4491_v13 = vsub.f32 %v4205_v20, %v4483_v7  ;;  %v4515_v5 = vsub.f32 %v4215_v38, %v4483_v7 }
 0xc6a   : > { %v4490_v14 = vsub.f32 %v4200_v23, %v4482_v26  ;;  %v4514_v28 = vsub.f32 %v4210_v31, %v4482_v26 }
 0xc6b   : > { %v4500_v32 = vmul.f32 1.442695, %v4491_v13  ;;  %v4524_v56 = vmul.f32 1.442695, %v4515_v5 }
 0xc6c   : > { %v4498_v54 = vmul.f32 1.442695, %v4490_v14  ;;  %v4522_v22 = vmul.f32 1.442695, %v4514_v28 }
 0xc6d   : > { %6073 = vpow2.f32 %v4500_v32  ;;  %v4674_v32 = vld [vmem:[%s7367_s13] sm:$0xff] }
 0xc6e   : > { %6075 = vpow2.f32 %v4524_v56  ;;  %v4675_v56 = vld [vmem:[%s7367_s13 + $0x8] sm:$0xff] }
 0xc6f   : > { %6077 = vpow2.f32 %v4498_v54 }
 0xc70   : > { %6079 = vpow2.f32 %v4522_v22  ;;  %v5765_v22 = vpack.c.bf16 %v4675_v56, %v4674_v32 }
 0xc72   : > { %5766 = vmatprep.subr.bf16.mxu1 %v5765_v22 }
 0xc73   : > { %v5569_v17 = vpop.f32.mrb[46].mxu0  ;;  %5768 = vmatpush3.bf16.msra.mxu1 %v5765_v22 }
 0xc74   : > { %v4287_v24 = vpop.f32.mrb[47].mxu0  ;;  %v4293_v34 = vadd.f32 %v5569_v17, %v7220_v53 }
 0xc75   : > { %v4288_v21 = vadd.f32 %v4287_v24, %v7225_v10 }
 0xc77   : > { %v6074_v58 = vpop.eup %6073  ;;  %v5572_v37 = vpop.f32.mrb[48].mxu0 }
 0xc78   : > { %v6076_v35 = vpop.eup %6075  ;;  %v4303_v36 = vadd.f32 %v5572_v37, %v7230_v18  ;;  %v4297_v16 = vpop.f32.mrb[49].mxu0 }
 0xc79   : > { %v6078_v12 = vpop.eup %6077  ;;  %v4539_v63 = vadd.f32 %v6076_v35, %v6074_v58  ;;  %v4298_v30 = vadd.f32 %v4297_v16, %v7236_v45 }
 0xc7a   : > { %v6080_v9 = vpop.eup %6079  ;;  %v4485_v19 = vmax.f32 %v4293_v34, %v4303_v36 }
 0xc7b   : > { %6081 = vrcp.f32 %v4539_v63  ;;  %v4538_v50 = vadd.f32 %v6080_v9, %v6078_v12  ;;  %v4484_v48 = vmax.f32 %v4288_v21, %v4298_v30 }
 0xc7c   : > { %v4493_v27 = vsub.f32 %v4293_v34, %v4485_v19  ;;  %v4517_v46 = vsub.f32 %v4303_v36, %v4485_v19  ;;  %v4676_v19 = vld [vmem:[%s7367_s13 + $0x10] sm:$0xff] }
 0xc7d   : > { %6083 = vrcp.f32 %v4538_v50  ;;  %v4492_v43 = vsub.f32 %v4288_v21, %v4484_v48  ;;  %v4516_v47 = vsub.f32 %v4298_v30, %v4484_v48  ;;  %v4677_v50 = vld [vmem:[%s7367_s13 + $0x18] sm:$0xff] }
 0xc7e   : > { %v4504_v6 = vmul.f32 1.442695, %v4493_v27  ;;  %v4528_v15 = vmul.f32 1.442695, %v4517_v46 }
 0xc7f   : > { %v4502_v49 = vmul.f32 1.442695, %v4492_v43  ;;  %v4526_v42 = vmul.f32 1.442695, %v4516_v47 }
 0xc80   : > { %6085 = vpow2.f32 %v4504_v6 }
 0xc81   : > { %6087 = vpow2.f32 %v4528_v15 }
 0xc82   : > { %6089 = vpow2.f32 %v4502_v49  ;;  %v5577_v2 = vpop.f32.mrb[46].mxu1 }
 0xc83   : > { %6091 = vpow2.f32 %v4526_v42  ;;  %v4375_v40 = vpop.f32.mrb[47].mxu1  ;;  %v4381_v38 = vadd.f32 %v5577_v2, %v7220_v53  ;;  %v5769_v42 = vpack.c.bf16 %v4677_v50, %v4676_v19 }
 0xc84   : > { %v4376_v3 = vadd.f32 %v4375_v40, %v7225_v10 }
 0xc85   : > { %v6082_v55 = vpop.eup %6081  ;;  %5770 = vmatprep.subr.bf16.mxu1 %v5769_v42 }
 0xc86   : > { %v4563_v61 = vmul.f32 %v6082_v55, %v6076_v35  ;;  %v4555_v20 = vmul.f32 %v6082_v55, %v6074_v58  ;;  %v5580_v23 = vpop.f32.mrb[48].mxu1  ;;  %v5585_v26 = vpop.f32.mrb[50].mxu0  ;;  %5772 = vmatpush3.bf16.msra.mxu1 %v5769_v42 }
 0xc87   : > { %v6084_v60 = vpop.eup %6083  ;;  %v4391_v31 = vadd.f32 %v5580_v23, %v7230_v18  ;;  %v4385_v7 = vpop.f32.mrb[49].mxu1  ;;  %v4469_v37 = vadd.f32 %v5585_v26, %v7220_v53 }
 0xc88   : > { %4625 = vperm.xlu0 %5823, %v4563_v61   ;;  %4577 = vperm.xlu1 %5824, %v4555_v20   ;;  %v4386_v13 = vadd.f32 %v4385_v7, %v7236_v45  ;;  %v4562_v5 = vmul.f32 %v6084_v60, %v6080_v9  ;;  %v4554_v14 = vmul.f32 %v6084_v60, %v6078_v12  ;;  %v4463_v28 = vpop.f32.mrb[51].mxu0 }
 0xc89   : > { %v4487_v54 = vmax.f32 %v4381_v38, %v4391_v31  ;;  %v4464_v35 = vadd.f32 %v4463_v28, %v7225_v10 }
 0xc8a   : > { %v6086_v17 = vpop.eup %6085  ;;  %v4486_v24 = vmax.f32 %v4376_v3, %v4386_v13  ;;  %v5588_v36 = vpop.f32.mrb[52].mxu0 }
 0xc8b   : > { %v6088_v34 = vpop.eup %6087  ;;  %v4495_v58 = vsub.f32 %v4381_v38, %v4487_v54  ;;  %v4519_v21 = vsub.f32 %v4391_v31, %v4487_v54  ;;  %v4473_v9 = vpop.f32.mrb[53].mxu0  ;;  %v4479_v27 = vadd.f32 %v5588_v36, %v7230_v18 }
 0xc8c   : > { %v6090_v16 = vpop.eup %6089  ;;  %v4541_v12 = vadd.f32 %v6088_v34, %v6086_v17  ;;  %v4494_v63 = vsub.f32 %v4376_v3, %v4486_v24  ;;  %v4518_v30 = vsub.f32 %v4386_v13, %v4486_v24  ;;  %4620 = vperm.xlu1 %5824, %v4562_v5   ;;  %4572 = vperm.xlu0 %5823, %v4554_v14  }
 0xc8d   : > { %v6092_v53 = vpop.eup %6091  ;;  %v4508_v48 = vmul.f32 1.442695, %v4495_v58  ;;  %v4532_v10 = vmul.f32 1.442695, %v4519_v21  ;;  %v4474_v46 = vadd.f32 %v4473_v9, %v7236_v45  ;;  %v4489_v15 = vmax.f32 %v4469_v37, %v4479_v27 }
 0xc8e   : > { %6093 = vrcp.f32 %v4541_v12  ;;  %v4540_v43 = vadd.f32 %v6092_v53, %v6090_v16  ;;  %v4506_v47 = vmul.f32 1.442695, %v4494_v63  ;;  %v4530_v6 = vmul.f32 1.442695, %v4518_v30 }
 0xc8f   : > { %6095 = vpow2.f32 %v4508_v48  ;;  %v4488_v49 = vmax.f32 %v4464_v35, %v4474_v46  ;;  %v4497_v2 = vsub.f32 %v4469_v37, %v4489_v15  ;;  %v4521_v40 = vsub.f32 %v4479_v27, %v4489_v15 }
 0xc90   : > { %6097 = vrcp.f32 %v4540_v43 }
 0xc91   : > { %6099 = vpow2.f32 %v4532_v10  ;;  %v4496_v55 = vsub.f32 %v4464_v35, %v4488_v49  ;;  %v4520_v61 = vsub.f32 %v4474_v46, %v4488_v49  ;;  %v4512_v18 = vmul.f32 1.442695, %v4497_v2 }
 0xc92   : > { %6101 = vpow2.f32 %v4506_v47  ;;  %v4536_v45 = vmul.f32 1.442695, %v4521_v40 }
 0xc93   : > { %6103 = vpow2.f32 %v4530_v6  ;;  %v4510_v20 = vmul.f32 1.442695, %v4496_v55  ;;  %v4534_v23 = vmul.f32 1.442695, %v4520_v61 }
 0xc94   : > { %6105 = vpow2.f32 %v4512_v18 }
 0xc95   : > { %6107 = vpow2.f32 %v4536_v45 }
 0xc96   : > { %6109 = vpow2.f32 %v4510_v20 }
 0xc97   : > { %6111 = vpow2.f32 %v4534_v23 }
 0xc98   : > { %v6094_v60 = vpop.eup %6093 }
 0xc99   : > { %v6096_v38 = vpop.eup %6095  ;;  %v4565_v3 = vmul.f32 %v6094_v60, %v6088_v34  ;;  %v4557_v31 = vmul.f32 %v6094_v60, %v6086_v17 }
 0xc9a   : > { %v6098_v7 = vpop.eup %6097 }
 0xc9b   : > { %v6100_v26 = vpop.eup %6099  ;;  %4635 = vperm.xlu0 %5823, %v4565_v3   ;;  %4587 = vperm.xlu1 %5824, %v4557_v31   ;;  %v4564_v13 = vmul.f32 %v6098_v7, %v6092_v53  ;;  %v4556_v5 = vmul.f32 %v6098_v7, %v6090_v16 }
 0xc9c   : > { %v6102_v14 = vpop.eup %6101  ;;  %v4543_v28 = vadd.f32 %v6100_v26, %v6096_v38 }
 0xc9d   : > { %v6104_v32 = vpop.eup %6103 }
 0xc9e   : > { %6113 = vrcp.f32 %v4543_v28  ;;  %v4542_v56 = vadd.f32 %v6104_v32, %v6102_v14  ;;  %v6106_v54 = vpop.eup %6105 }
 0xc9f   : > { %4630 = vperm.xlu0 %5823, %v4564_v13   ;;  %4582 = vperm.xlu1 %5824, %v4556_v5   ;;  %v6108_v22 = vpop.eup %6107 }
 0xca0   : > { %6115 = vrcp.f32 %v4542_v56  ;;  %v6110_v24 = vpop.eup %6109  ;;  %v4545_v58 = vadd.f32 %v6108_v22, %v6106_v54 }
 0xca1   : > { %v6112_v34 = vpop.eup %6111 }
 0xca2   : > { %6117 = vrcp.f32 %v4545_v58  ;;  %v4544_v17 = vadd.f32 %v6112_v34, %v6110_v24 }
 0xca4   : > { %6119 = vrcp.f32 %v4544_v17 }
 0xca8   : > { %v6114_v21 = vpop.eup %6113 }
 0xca9   : > { %v4567_v37 = vmul.f32 %v6114_v21, %v6100_v26  ;;  %v4559_v35 = vmul.f32 %v6114_v21, %v6096_v38 }
 0xcaa   : > { %v6116_v36 = vpop.eup %6115 }
 0xcab   : > { %4645 = vperm.xlu0 %5823, %v4567_v37   ;;  %4597 = vperm.xlu1 %5824, %v4559_v35   ;;  %v4566_v16 = vmul.f32 %v6116_v36, %v6104_v32  ;;  %v4558_v12 = vmul.f32 %v6116_v36, %v6102_v14 }
 0xcac   : > { %v6118_v63 = vpop.eup %6117 }
 0xcad   : > { %v4569_v30 = vmul.f32 %v6118_v63, %v6108_v22  ;;  %v4561_v9 = vmul.f32 %v6118_v63, %v6106_v54 }
 0xcae   : > { %v6120_v19 = vpop.eup %6119 }
 0xcaf   : > { %4640 = vperm.xlu0 %5823, %v4566_v16   ;;  %4592 = vperm.xlu1 %5824, %v4558_v12   ;;  %v4568_v50 = vmul.f32 %v6120_v19, %v6112_v34  ;;  %v4560_v53 = vmul.f32 %v6120_v19, %v6110_v24 }
 0xcb3   : > { %4650 = vperm.xlu0 %5823, %v4568_v50   ;;  %4602 = vperm.xlu1 %5824, %v4560_v53  }
 0xcb7   : > { %4655 = vperm.xlu0 %5823, %v4569_v30   ;;  %4607 = vperm.xlu1 %5824, %v4561_v9  }
 0xd07   : > { %v4626_v48 = vpop.permute.xlu0 %4625  ;;  %v4578_v10 = vpop.permute.xlu1 %4577 }
 0xd08   : > { %v4659_v27 = vmul.f32 %v7073_v33, %v4626_v48  ;;  %v4611_v46 = vmul.f32 %v6787_v51, %v4578_v10 }
 0xd0a   : > { %v4667_v43 = vadd.f32 %v4659_v27, %v4611_v46 }
 0xd0b   : > { %v4573_v47 = vpop.permute.xlu0 %4572  ;;  %v4621_v6 = vpop.permute.xlu1 %4620 }
 0xd0c   : > { %v4610_v15 = vmul.f32 %v4573_v47, %v6789_v59  ;;  %v4658_v49 = vmul.f32 %v4621_v6, %v7077_v29 }
 0xd0e   : > { %v4666_v42 = vadd.f32 %v4658_v49, %v4610_v15 }
 0xd10   : > { %5597 = vmatprep.mubr.msk.f32.mxu1 %vm518_vm0, %v4666_v42 }
 0xd11   : > { %5598 = vmatmul.mubr.msk.f32.vlgmr.msra.gmra.mrb[50].mxu1 %vm518_vm0, %v4667_v43 }
 0xd1a   : > { %v4636_v2 = vpop.permute.xlu0 %4635  ;;  %v4588_v40 = vpop.permute.xlu1 %4587 }
 0xd1b   : > { %v4661_v55 = vmul.f32 %v7083_v52, %v4636_v2  ;;  %v4613_v33 = vmul.f32 %v6791_v62, %v4588_v40 }
 0xd1d   : > { %v4669_v61 = vadd.f32 %v4661_v55, %v4613_v33 }
 0xd1e   : > { %v4631_v51 = vpop.permute.xlu0 %4630  ;;  %v4583_v18 = vpop.permute.xlu1 %4582 }
 0xd1f   : > { %v4660_v45 = vmul.f32 %v4631_v51, %v7087_v1  ;;  %v4612_v59 = vmul.f32 %v4583_v18, %v6793_v4 }
 0xd21   : > { %v4668_v20 = vadd.f32 %v4660_v45, %v4612_v59 }
 0xd23   : > { %5600 = vmatprep.mubr.msk.f32.mxu1 %vm518_vm0, %v4668_v20 }
 0xd24   : > { %5601 = vmatmul.mubr.msk.f32.gmra.mrb[52].mxu1 %vm518_vm0, %v4669_v61 }
 0xd2a   : > { %v4646_v29 = vpop.permute.xlu0 %4645  ;;  %v4598_v23 = vpop.permute.xlu1 %4597 }
 0xd2b   : > { %v4663_v60 = vmul.f32 %v7093_v25, %v4646_v29  ;;  %v4615_v52 = vmul.f32 %v6795_v44, %v4598_v23 }
 0xd2d   : > { %v4671_v38 = vadd.f32 %v4663_v60, %v4615_v52 }
 0xd2e   : > { %v4641_v62 = vpop.permute.xlu0 %4640  ;;  %v4593_v3 = vpop.permute.xlu1 %4592 }
 0xd2f   : > { %v4662_v31 = vmul.f32 %v4641_v62, %v7097_v0  ;;  %v4614_v1 = vmul.f32 %v4593_v3, %v6797_v8 }
 0xd31   : > { %v4670_v4 = vadd.f32 %v4662_v31, %v4614_v1 }
 0xd32   : > { %v4651_v7 = vpop.permute.xlu0 %4650  ;;  %v4603_v26 = vpop.permute.xlu1 %4602 }
 0xd33   : > { %v4664_v13 = vmul.f32 %v4651_v7, %v7107_v41  ;;  %v4616_v5 = vmul.f32 %v4603_v26, %v6801_v11  ;;  %5603 = vmatprep.mubr.msk.f32.mxu1 %vm518_vm0, %v4670_v4  ;;  %v5065_v11 = vld [vmem:[%s7368_s14] ss:$0 sm:$0xff] }
 0xd34   : > { %5604 = vmatmul.mubr.msk.f32.gmra.mrb[54].mxu1 %vm518_vm0, %v4671_v38 }
 0xd35   : > { %v4672_v44 = vadd.f32 %v4664_v13, %v4616_v5 }
 0xd36   : > { %v4656_v25 = vpop.permute.xlu0 %4655  ;;  %v4608_v14 = vpop.permute.xlu1 %4607 }
 0xd37   : > { %v4665_v0 = vmul.f32 %v7102_v57, %v4656_v25  ;;  %v4617_v8 = vmul.f32 %v6799_v39, %v4608_v14  ;;  %5606 = vmatprep.mubr.msk.f32.mxu1 %vm518_vm0, %v4672_v44 }
 0xd39   : > { %v4673_v28 = vadd.f32 %v4665_v0, %v4617_v8 }
 0xd3b   : > { %5607 = vmatmul.mubr.msk.f32.gmra.mrb[56].mxu1 %vm518_vm0, %v4673_v28 }
 0xde4   : > { %v5599_v41 = vpop.f32.mrb[50].mxu1 }
 0xde5   : > { %v4781_v32 = vadd.f32 %v5599_v41, %v5065_v11  ;;  %v4775_v56 = vpop.f32.mrb[51].mxu1 }
 0xde6   : > { %v4776_v54 = vadd.f32 %v5065_v11, %v4775_v56 }
 0xde7   : > { %4815 = vst.msk [vmem:[%s490_s26 + $0x8] sm:$0xff] %vm518_vm0, %v4781_v32 }
 0xde8   : > { %4814 = vst.msk [vmem:[%s490_s26] sm:$0xff] %vm518_vm0, %v4776_v54 }
 0xdf7   : > { %v5602_v39 = vpop.f32.mrb[52].mxu1 }
 0xdf8   : > { %v4791_v57 = vadd.f32 %v5602_v39, %v5065_v11  ;;  %v4785_v22 = vpop.f32.mrb[53].mxu1 }
 0xdf9   : > { %v4786_v24 = vadd.f32 %v5065_v11, %v4785_v22 }
 0xdfa   : > { %4817 = vst.msk [vmem:[%s490_s26 + $0x18] sm:$0xff] %vm518_vm0, %v4791_v57 }
 0xdfb   : > { %4816 = vst.msk [vmem:[%s490_s26 + $0x10] sm:$0xff] %vm518_vm0, %v4786_v24 }
 0xe07   : > { %v5605_v58 = vpop.f32.mrb[54].mxu1 }
 0xe08   : > { %v4801_v34 = vadd.f32 %v5605_v58, %v5065_v11  ;;  %v4795_v17 = vpop.f32.mrb[55].mxu1 }
 0xe09   : > { %v4796_v21 = vadd.f32 %v5065_v11, %v4795_v17 }
 0xe0a   : > { %4819 = vst.msk [vmem:[%s490_s26 + $0x28] sm:$0xff] %vm518_vm0, %v4801_v34 }
 0xe0b   : > { %4818 = vst.msk [vmem:[%s490_s26 + $0x20] sm:$0xff] %vm518_vm0, %v4796_v21 }
 0xe0e   : > { %v5608_v37 = vpop.f32.mrb[56].mxu1 }
 0xe0f   : > { %v4811_v35 = vadd.f32 %v5608_v37, %v5065_v11  ;;  %v4805_v36 = vpop.f32.mrb[57].mxu1 }
 0xe10   : > { %v4806_v16 = vadd.f32 %v5065_v11, %v4805_v36 }
 0xe11   : > { %4821 = vst.msk [vmem:[%s490_s26 + $0x38] sm:$0xff] %vm518_vm0, %v4811_v35 }
 0xe12   : > { %4820 = vst.msk [vmem:[%s490_s26 + $0x30] sm:$0xff] %vm518_vm0, %v4806_v16 }
 0xe13   : > { %6134 = shalt.err (!%p6131_p3)
}
 0xe14   : > { %s6135_s20 = scalar_lea.hbm %s7305_s24, 1024  ;;  %s6139_s25 = scalar_lea.hbm %s7369_s15, 2048 }
 0xe15   : > { %p6136_p4 = scmp.ne.s32.totalorder %s7305_s24, %s6135_s20  ;;  %p6140_p9 = scmp.lt.u32.totalorder %s7305_s24, %s7369_s15 }
 0xe16   : > { %p6141_p10 = scmp.lt.u32.totalorder %s6139_s25, %s6135_s20  ;;  %p6143_p12 = scmp.lt.u32.totalorder %s6135_s20, %s7305_s24 }
 0xe17   : > { %p6137_p7 = pnand %p6136_p4, %p6313_p5 }
 0xe18   : > { %p6142_p11 = por %p6141_p10, %p6140_p9 }
 0xe19   : > { %p6138_p8 = pneg %p6137_p7 }
 0xe1a   : > { %p6144_p13 = por %p6143_p12, %p6142_p11 }
 0xe1c   : > { %p6145_p0 = pnand %p6144_p13, %p6138_p8 }
 0xe1e   : > { %6148 = shalt.err (!%p6145_p0)
}
 0xe1f   : > { %s6193_s27 = smov 128   ;;  %s6194_s17 = smov 8  }
 0xe20   : > { %5775 = dma.vmem_to_hbm [thread:$0]  (%p6313_p5), %s7307_s16, 1024, %s7305_s24, %s7313_s22, %s6193_s27, %s6193_s27, %s6194_s17  }
 0xe21 PF: > { %p5781_p1 = scmp.ge.s32.totalorder %s6183_s21, 2  ;;  %s4852_s0 = sand.u32 1, %s6171_s18  }
 0xe22   : > { %s4853_s20 = scalar_lea.sflag [#allocation3], %s4852_s0 }
 0xe23   : > { %p5778_p2 = pnand %p5781_p1, %p6317_p6 }
 0xe25   : > { %6166 = dma.done.wait (!%p5778_p2), %s4853_s20, 1024  }
 0xe26   : > { %6168 = vsyncadd (!%p5778_p2), %s4853_s20, 4294966272  ;;  %s7384_s21 = sld [smem:[#allocation6_spill]]  ;;  %s7385_s26 = sld [smem:[#allocation5_spill]] }
 0xe27   : > { %s7386_s20 = sld [smem:[#allocation7_spill]]  ;;  %s7387_s18 = smov %s6175_s19 }
 0xe2c   : > { %p25_p3 = scmp.ge.s32.totalorder %s7384_s21, 4   ;;  %s7388_s19 = smov %s7385_s26 }
 0xe2e   :  { %27 = sbr.rel (!%p25_p3) target bundleno = 5 (0x5), region = 115 }
 0xe35   :  { %4858 = vsyncpa [#allocation3], 1 }
 0xe36   :  { %4860 = vsyncpa [#allocation3 + $0x1], 1 }

</bundles_post_ra>
